<compile_context>
chip_gen: v7x
topology: tpu7x:2x2x1
jax: 0.10.0
libtpu: 0.0.40
codegen_flags: <defaults>
</compile_context>

<pallas_src>
import functools

import jax
import jax.numpy as jnp
from jax import lax
from jax.experimental import pallas as pl
from jax.experimental.pallas import tpu as pltpu

_F32 = jnp.float32
_VMEM_LIMIT = 48 * 1024 * 1024


def _gelu_exact(x):
    # torch.nn.GELU() default = exact erf formulation.
    return 0.5 * x * (1.0 + lax.erf(x * jnp.float32(0.7071067811865476)))


def _dwconv3x3_from_padded(pad_ref, w_ref, h, w, c):
    """3x3 depthwise conv reading a zero-padded [h+2, w+2, c] VMEM scratch."""
    xp = pad_ref[...]                                      # [h+2, w+2, c] f32
    acc = jnp.zeros((h, w, c), dtype=_F32)
    for di in range(3):
        for dj in range(3):
            acc = acc + xp[di:di + h, dj:dj + w, :] * w_ref[di, dj, :]
    return acc


# ----------------------------------------------------------------------------
# Fused MS_MSA kernel:  QKV -> per-head normalized attention -> proj
#                       + pos_emb (dwconv/GELU/dwconv on v_inp)
#                       + SN_MSAB residual (x = MS_MSA(x) + x)
# ----------------------------------------------------------------------------
def _msa_kernel(x_ref, wqkv_ref, rescale_ref, mask_ref, wp_ref, bp_ref,
                conv1_ref, conv2_ref, out_ref, pad_ref, *, h, w, hd):
    n, c = x_ref.shape[1], x_ref.shape[2]
    xf = x_ref[0]                                          # [n, c]

    # One fused QKV matmul (single MXU weight push instead of three).
    qkv = jnp.dot(xf, wqkv_ref[...], preferred_element_type=_F32)   # [n, 3*hd]
    q = qkv[:, 0:hd]
    k = qkv[:, hd:2 * hd]
    v = qkv[:, 2 * hd:3 * hd]                              # raw v_inp (pos_emb uses it too)

    # F.normalize(dim=-1) after the head-split/transpose == per-column L2
    # normalization over n of the flat [n, hd] projections (eps = 1e-12).
    q = q * lax.rsqrt(jnp.maximum(jnp.sum(q * q, axis=0, keepdims=True), 1e-24))
    k = k * lax.rsqrt(jnp.maximum(jnp.sum(k * k, axis=0, keepdims=True), 1e-24))
    # Per-head rescale folded into q's columns (rescale[head(j)]).
    q = q * rescale_ref[...]                               # [1, hd] broadcast

    # All heads in ONE gram matmul: logits[i, j] = sum_n k[n, i] * q[n, j].
    # Cross-head (i, j) entries are killed by the additive block-diagonal mask,
    # so the row softmax below is exactly the per-head softmax of the reference.
    logits = lax.dot_general(k, q, (((0,), (0,)), ((), ())),
                             preferred_element_type=_F32)  # [hd, hd]
    logits = logits + mask_ref[...]
    logits = logits - jnp.max(logits, axis=-1, keepdims=True)
    p = jnp.exp(logits)
    p = p * pl.reciprocal(jnp.sum(p, axis=-1, keepdims=True), approx=True)

    # out_attn[n, i] = sum_j p[i, j] * v[n, j]  (p is block-diagonal => per-head attn @ v)
    out_attn = lax.dot_general(v, p, (((1,), (1,)), ((), ())),
                               preferred_element_type=_F32)            # [n, hd]
    out_c = jnp.dot(out_attn, wp_ref[...], preferred_element_type=_F32) + bp_ref[...]

    # pos_emb path fused: v_inp stays in VMEM; zero-pad into scratch (no jnp.pad
    # HBM round trip), depthwise 3x3 -> GELU -> depthwise 3x3.
    pad_ref[...] = jnp.zeros_like(pad_ref)
    pad_ref[1:h + 1, 1:w + 1, :] = v.reshape(h, w, hd)
    z = _gelu_exact(_dwconv3x3_from_padded(pad_ref, conv1_ref, h, w, hd))
    pad_ref[1:h + 1, 1:w + 1, :] = z                       # border stays zero
    out_p = _dwconv3x3_from_padded(pad_ref, conv2_ref, h, w, hd).reshape(n, hd)

    # MS_MSA output + SN_MSAB residual in one store.
    out_ref[0] = (out_c + out_p + xf).astype(out_ref.dtype)


def _msa_block(x, p, h, w):
    b, n, c = x.shape
    hd = c
    kernel = functools.partial(_msa_kernel, h=h, w=w, hd=hd)
    return pl.pallas_call(
        kernel,
        grid=(b,),
        in_specs=[
            pl.BlockSpec((1, n, c), lambda i: (i, 0, 0)),            # x
            pl.BlockSpec((c, 3 * hd), lambda i: (0, 0)),             # fused W_q|W_k|W_v
            pl.BlockSpec((1, hd), lambda i: (0, 0)),                 # per-column rescale
            pl.BlockSpec((hd, hd), lambda i: (0, 0)),                # block-diagonal mask bias
            pl.BlockSpec((hd, c), lambda i: (0, 0)),                 # W_proj
            pl.BlockSpec((1, c), lambda i: (0, 0)),                  # b_proj
            pl.BlockSpec((3, 3, hd), lambda i: (0, 0, 0)),           # pos_emb conv1 (depthwise)
            pl.BlockSpec((3, 3, hd), lambda i: (0, 0, 0)),           # pos_emb conv2 (depthwise)
        ],
        out_specs=pl.BlockSpec((1, n, c), lambda i: (i, 0, 0)),
        out_shape=jax.ShapeDtypeStruct((b, n, c), x.dtype),
        scratch_shapes=[pltpu.VMEM((h + 2, w + 2, hd), _F32)],       # in-VMEM halo pad buffer
        compiler_params=pltpu.CompilerParams(
            dimension_semantics=("parallel",),
            vmem_limit_bytes=_VMEM_LIMIT),
    )(x, p["wqkv"], p["rescale_cols"], p["mask"], p["wp"], p["bp"],
      p["conv1"], p["conv2"])


# ----------------------------------------------------------------------------
# Fused FeedForward kernel:  1x1 conv -> GELU -> depthwise 3x3 -> GELU -> 1x1
#                            + SN_MSAB residual (x = FF(x) + x)
# ----------------------------------------------------------------------------
def _ff_kernel(x_ref, w1_ref, wdw_ref, w2_ref, out_ref, pad_ref, *, h, w):
    n = x_ref.shape[1]
    cm = w1_ref.shape[1]
    xf = x_ref[0]                                          # [n, c]

    y1 = _gelu_exact(jnp.dot(xf, w1_ref[...], preferred_element_type=_F32))   # [n, cm]

    pad_ref[...] = jnp.zeros_like(pad_ref)
    pad_ref[1:h + 1, 1:w + 1, :] = y1.reshape(h, w, cm)
    z = _gelu_exact(_dwconv3x3_from_padded(pad_ref, wdw_ref, h, w, cm)).reshape(n, cm)

    y2 = jnp.dot(z, w2_ref[...], preferred_element_type=_F32)                 # [n, c]
    out_ref[0] = (y2 + xf).astype(out_ref.dtype)


def _ff_block(x, p, h, w):
    b, n, c = x.shape
    cm = p["w1"].shape[1]
    kernel = functools.partial(_ff_kernel, h=h, w=w)
    return pl.pallas_call(
        kernel,
        grid=(b,),
        in_specs=[
            pl.BlockSpec((1, n, c), lambda i: (i, 0, 0)),            # x
            pl.BlockSpec((c, cm), lambda i: (0, 0)),                 # 1x1 conv #1
            pl.BlockSpec((3, 3, cm), lambda i: (0, 0, 0)),           # depthwise 3x3
            pl.BlockSpec((cm, c), lambda i: (0, 0)),                 # 1x1 conv #2
        ],
        out_specs=pl.BlockSpec((1, n, c), lambda i: (i, 0, 0)),
        out_shape=jax.ShapeDtypeStruct((b, n, c), x.dtype),
        scratch_shapes=[pltpu.VMEM((h + 2, w + 2, cm), _F32)],
        compiler_params=pltpu.CompilerParams(
            dimension_semantics=("parallel",),
            vmem_limit_bytes=_VMEM_LIMIT),
    )(x, p["w1"], p["wdw"], p["w2"])


# ----------------------------------------------------------------------------
# Parameter setup (plain-JAX glue, incl. spectral normalization) + full forward
# ----------------------------------------------------------------------------
def _spectral_normalize(w_pt, key, n_iters=3, eps=1e-12):
    """PyTorch-style spectral norm: divide by the top singular value of
    w reshaped to (out, -1), estimated with power iteration."""
    out_dim = w_pt.shape[0]
    w2 = w_pt.reshape(out_dim, -1)
    u = jax.random.normal(key, (out_dim,), dtype=w_pt.dtype)
    u = u / jnp.maximum(jnp.linalg.norm(u), eps)
    v = None
    for _ in range(n_iters):
        v = w2.T @ u
        v = v / jnp.maximum(jnp.linalg.norm(v), eps)
        u = w2 @ v
        u = u / jnp.maximum(jnp.linalg.norm(u), eps)
    sigma = u @ (w2 @ v)
    return w_pt / sigma


def init_sn_msab_params(key, dim, dim_head, heads, num_blocks, mult=4):
    hd = dim_head * heads
    assert hd == dim, "MS_MSA residual/pos_emb requires dim == heads * dim_head"
    dm = dim * mult
    scale = 0.1

    head_id = jnp.arange(hd) // dim_head
    mask = jnp.where(head_id[:, None] == head_id[None, :], 0.0, -1e30).astype(_F32)

    blocks = []
    for bk in jax.random.split(key, num_blocks):
        ks = jax.random.split(bk, 19)
        # PyTorch-convention weights [out, in] / [out, in/groups, kh, kw]
        wq = _spectral_normalize(scale * jax.random.normal(ks[0], (hd, dim)), ks[1])
        wk = _spectral_normalize(scale * jax.random.normal(ks[2], (hd, dim)), ks[3])
        wv = _spectral_normalize(scale * jax.random.normal(ks[4], (hd, dim)), ks[5])
        wp = _spectral_normalize(scale * jax.random.normal(ks[6], (dim, hd)), ks[7])
        bp = scale * jax.random.normal(ks[8], (dim,))
        conv1 = _spectral_normalize(scale * jax.random.normal(ks[9], (dim, 1, 3, 3)), ks[10])
        conv2 = _spectral_normalize(scale * jax.random.normal(ks[11], (dim, 1, 3, 3)), ks[12])
        rescale = jnp.ones((heads,), _F32)                  # torch.ones(heads, 1, 1)

        ff_w1 = _spectral_normalize(scale * jax.random.normal(ks[13], (dm, dim, 1, 1)), ks[14])
        ff_dw = _spectral_normalize(scale * jax.random.normal(ks[15], (dm, 1, 3, 3)), ks[16])
        ff_w2 = _spectral_normalize(scale * jax.random.normal(ks[17], (dim, dm, 1, 1)), ks[18])

        msa = {
            "wqkv": jnp.concatenate([wq.T, wk.T, wv.T], axis=1).astype(_F32),   # [dim, 3*hd]
            "wp": wp.T.astype(_F32),                                            # [hd, dim]
            "bp": bp.reshape(1, dim).astype(_F32),
            "rescale_cols": jnp.repeat(rescale, dim_head).reshape(1, hd).astype(_F32),
            "mask": mask,
            "conv1": jnp.transpose(conv1[:, 0], (1, 2, 0)).astype(_F32),        # [3, 3, dim]
            "conv2": jnp.transpose(conv2[:, 0], (1, 2, 0)).astype(_F32),
        }
        ff = {
            "w1": ff_w1.reshape(dm, dim).T.astype(_F32),                        # [dim, dm]
            "wdw": jnp.transpose(ff_dw[:, 0], (1, 2, 0)).astype(_F32),          # [3, 3, dm]
            "w2": ff_w2.reshape(dim, dm).T.astype(_F32),                        # [dm, dim]
        }
        blocks.append({"msa": msa, "ff": ff})
    return blocks


def sn_msab_forward(x, params):
    """x: [b, c, h, w]  ->  out: [b, c, h, w]   (matches SN_MSAB.forward)."""
    b, c, h, w = x.shape
    n = h * w
    xl = jnp.transpose(x, (0, 2, 3, 1)).reshape(b, n, c)   # channels-last, flattened
    for blk in params:
        xl = _msa_block(xl, blk["msa"], h, w)              # MS_MSA(x) + x   (residual fused)
        xl = _ff_block(xl, blk["ff"], h, w)                # FeedForward(x) + x
    return jnp.transpose(xl.reshape(b, h, w, c), (0, 3, 1, 2))


if __name__ == "__main__":
    key = jax.random.PRNGKey(0)
    k_param, k_x = jax.random.split(key)

    b, h, w = 2, 8, 8
    dim, heads, dim_head, num_blocks = 16, 2, 8, 2         # dim == heads * dim_head

    params = init_sn_msab_params(k_param, dim, dim_head, heads, num_blocks)
    x = jax.random.normal(k_x, (b, dim, h, w), dtype=jnp.float32)

    out = sn_msab_forward(x, params)
    jax.block_until_ready(out)
    assert out.shape == (b, dim, h, w)
    print("KERNEL_OK")
</pallas_src>

<mosaic_0001>
module attributes {stable_mosaic.version = 11 : i64} {
  func.func @_msa_kernel(%arg0: i32, %arg1: memref<1x64x16xf32, #tpu.memory_space<vmem>>, %arg2: memref<16x48xf32, #tpu.memory_space<vmem>>, %arg3: memref<1x16xf32, #tpu.memory_space<vmem>>, %arg4: memref<16x16xf32, #tpu.memory_space<vmem>>, %arg5: memref<16x16xf32, #tpu.memory_space<vmem>>, %arg6: memref<1x16xf32, #tpu.memory_space<vmem>>, %arg7: memref<3x3x16xf32, #tpu.memory_space<vmem>>, %arg8: memref<3x3x16xf32, #tpu.memory_space<vmem>>, %arg9: memref<1x64x16xf32, #tpu.memory_space<vmem>>, %arg10: memref<10x10x16xf32, #tpu.memory_space<vmem>>) attributes {dimension_semantics = [#tpu.dimension_semantics<parallel>], iteration_bounds = array<i64: 2>, scalar_prefetch = 0 : i64, scratch_operands = 1 : i64, tpu.core_type = #tpu.core_type<tc>, window_params = [{transform_indices = @transform_0, window_bounds = array<i64: 1, 64, 16>}, {pipeline_mode = #tpu.pipeline_mode<synchronous>, transform_indices = @transform_1, window_bounds = array<i64: 16, 48>}, {pipeline_mode = #tpu.pipeline_mode<synchronous>, transform_indices = @transform_2, window_bounds = array<i64: 1, 16>}, {pipeline_mode = #tpu.pipeline_mode<synchronous>, transform_indices = @transform_3, window_bounds = array<i64: 16, 16>}, {pipeline_mode = #tpu.pipeline_mode<synchronous>, transform_indices = @transform_4, window_bounds = array<i64: 16, 16>}, {pipeline_mode = #tpu.pipeline_mode<synchronous>, transform_indices = @transform_5, window_bounds = array<i64: 1, 16>}, {pipeline_mode = #tpu.pipeline_mode<synchronous>, transform_indices = @transform_6, window_bounds = array<i64: 3, 3, 16>}, {pipeline_mode = #tpu.pipeline_mode<synchronous>, transform_indices = @transform_7, window_bounds = array<i64: 3, 3, 16>}, {transform_indices = @transform_8, window_bounds = array<i64: 1, 64, 16>}]} {
    %c0 = arith.constant 0 : index
    %c0_0 = arith.constant 0 : index
    %c0_1 = arith.constant 0 : index
    %0 = vector.load %arg1[%c0, %c0_0, %c0_1] : memref<1x64x16xf32, #tpu.memory_space<vmem>>, vector<1x64x16xf32>
    %1 = vector.shape_cast %0 : vector<1x64x16xf32> to vector<64x16xf32>
    %c0_2 = arith.constant 0 : index
    %c0_3 = arith.constant 0 : index
    %2 = vector.load %arg2[%c0_2, %c0_3] : memref<16x48xf32, #tpu.memory_space<vmem>>, vector<16x48xf32>
    %cst = arith.constant dense<0.000000e+00> : vector<64x48xf32>
    %3 = tpu.matmul %1, %2, %cst {dimension_numbers = #tpu.dot_dimension_numbers<[1], [0], [0], [1], [0, 0, 1, 1], [], []>} : vector<64x16xf32>, vector<16x48xf32>, vector<64x48xf32> -> vector<64x48xf32>
    %4 = vector.extract_strided_slice %3 {offsets = [0, 0], sizes = [64, 16], strides = [1, 1]} : vector<64x48xf32> to vector<64x16xf32>
    %5 = vector.extract_strided_slice %3 {offsets = [0, 16], sizes = [64, 16], strides = [1, 1]} : vector<64x48xf32> to vector<64x16xf32>
    %6 = vector.extract_strided_slice %3 {offsets = [0, 32], sizes = [64, 16], strides = [1, 1]} : vector<64x48xf32> to vector<64x16xf32>
    %7 = arith.mulf %4, %4 : vector<64x16xf32>
    %cst_4 = arith.constant dense<0.000000e+00> : vector<16xf32>
    %8 = vector.multi_reduction <add>, %7, %cst_4 [0] : vector<64x16xf32> to vector<16xf32>
    %9 = vector.shape_cast %8 : vector<16xf32> to vector<1x16xf32>
    %cst_5 = arith.constant 1.000000e-24 : f32
    %10 = vector.broadcast %cst_5 : f32 to vector<1x16xf32>
    %11 = arith.maximumf %9, %10 : vector<1x16xf32>
    %12 = math.rsqrt %11 : vector<1x16xf32>
    %13 = vector.broadcast %12 : vector<1x16xf32> to vector<64x16xf32>
    %14 = arith.mulf %4, %13 : vector<64x16xf32>
    %15 = arith.mulf %5, %5 : vector<64x16xf32>
    %cst_6 = arith.constant dense<0.000000e+00> : vector<16xf32>
    %16 = vector.multi_reduction <add>, %15, %cst_6 [0] : vector<64x16xf32> to vector<16xf32>
    %17 = vector.shape_cast %16 : vector<16xf32> to vector<1x16xf32>
    %cst_7 = arith.constant 1.000000e-24 : f32
    %18 = vector.broadcast %cst_7 : f32 to vector<1x16xf32>
    %19 = arith.maximumf %17, %18 : vector<1x16xf32>
    %20 = math.rsqrt %19 : vector<1x16xf32>
    %21 = vector.broadcast %20 : vector<1x16xf32> to vector<64x16xf32>
    %22 = arith.mulf %5, %21 : vector<64x16xf32>
    %c0_8 = arith.constant 0 : index
    %c0_9 = arith.constant 0 : index
    %23 = vector.load %arg3[%c0_8, %c0_9] : memref<1x16xf32, #tpu.memory_space<vmem>>, vector<1x16xf32>
    %24 = vector.broadcast %23 : vector<1x16xf32> to vector<64x16xf32>
    %25 = arith.mulf %14, %24 : vector<64x16xf32>
    %cst_10 = arith.constant dense<0.000000e+00> : vector<16x16xf32>
    %26 = tpu.matmul %22, %25, %cst_10 {dimension_numbers = #tpu.dot_dimension_numbers<[0], [0], [1], [1], [0, 1, 1, 1], [], []>} : vector<64x16xf32>, vector<64x16xf32>, vector<16x16xf32> -> vector<16x16xf32>
    %c0_11 = arith.constant 0 : index
    %c0_12 = arith.constant 0 : index
    %27 = vector.load %arg4[%c0_11, %c0_12] : memref<16x16xf32, #tpu.memory_space<vmem>>, vector<16x16xf32>
    %28 = arith.addf %26, %27 : vector<16x16xf32>
    %cst_13 = arith.constant dense<0xFF800000> : vector<16xf32>
    %29 = vector.multi_reduction <maximumf>, %28, %cst_13 [1] : vector<16x16xf32> to vector<16xf32>
    %30 = vector.shape_cast %29 : vector<16xf32> to vector<16x1xf32>
    %31 = vector.broadcast %30 : vector<16x1xf32> to vector<16x16xf32>
    %32 = arith.subf %28, %31 : vector<16x16xf32>
    %33 = math.exp %32 : vector<16x16xf32>
    %cst_14 = arith.constant dense<0.000000e+00> : vector<16xf32>
    %34 = vector.multi_reduction <add>, %33, %cst_14 [1] : vector<16x16xf32> to vector<16xf32>
    %35 = vector.shape_cast %34 : vector<16xf32> to vector<16x1xf32>
    %36 = tpu.reciprocal %35 {approx = true} : vector<16x1xf32> -> vector<16x1xf32>
    %37 = vector.broadcast %36 : vector<16x1xf32> to vector<16x16xf32>
    %38 = arith.mulf %33, %37 : vector<16x16xf32>
    %cst_15 = arith.constant dense<0.000000e+00> : vector<64x16xf32>
    %39 = tpu.matmul %6, %38, %cst_15 {dimension_numbers = #tpu.dot_dimension_numbers<[1], [1], [0], [0], [0, 0, 1, 0], [], []>} : vector<64x16xf32>, vector<16x16xf32>, vector<64x16xf32> -> vector<64x16xf32>
    %c0_16 = arith.constant 0 : index
    %c0_17 = arith.constant 0 : index
    %40 = vector.load %arg5[%c0_16, %c0_17] : memref<16x16xf32, #tpu.memory_space<vmem>>, vector<16x16xf32>
    %cst_18 = arith.constant dense<0.000000e+00> : vector<64x16xf32>
    %41 = tpu.matmul %39, %40, %cst_18 {dimension_numbers = #tpu.dot_dimension_numbers<[1], [0], [0], [1], [0, 0, 1, 1], [], []>} : vector<64x16xf32>, vector<16x16xf32>, vector<64x16xf32> -> vector<64x16xf32>
    %c0_19 = arith.constant 0 : index
    %c0_20 = arith.constant 0 : index
    %42 = vector.load %arg6[%c0_19, %c0_20] : memref<1x16xf32, #tpu.memory_space<vmem>>, vector<1x16xf32>
    %43 = vector.broadcast %42 : vector<1x16xf32> to vector<64x16xf32>
    %44 = arith.addf %41, %43 : vector<64x16xf32>
    %cst_21 = arith.constant 0.000000e+00 : f32
    %45 = vector.broadcast %cst_21 : f32 to vector<10x10x16xf32>
    %c0_22 = arith.constant 0 : index
    %c0_23 = arith.constant 0 : index
    %c0_24 = arith.constant 0 : index
    %46 = vector.load %arg10[%c0_22, %c0_23, %c0_24] : memref<10x10x16xf32, #tpu.memory_space<vmem>>, vector<10x10x16xf32>
    tpu.vector_store %arg10[%c0_22, %c0_23, %c0_24], %45 {strides = array<i32>} : memref<10x10x16xf32, #tpu.memory_space<vmem>>, vector<10x10x16xf32>,
    %47 = vector.shape_cast %6 : vector<64x16xf32> to vector<8x8x16xf32>
    %c1 = arith.constant 1 : index
    %c1_25 = arith.constant 1 : index
    %c0_26 = arith.constant 0 : index
    %48 = vector.load %arg10[%c1, %c1_25, %c0_26] : memref<10x10x16xf32, #tpu.memory_space<vmem>>, vector<8x8x16xf32>
    tpu.vector_store %arg10[%c1, %c1_25, %c0_26], %47 {strides = array<i32>} : memref<10x10x16xf32, #tpu.memory_space<vmem>>, vector<8x8x16xf32>,
    %c0_27 = arith.constant 0 : index
    %c0_28 = arith.constant 0 : index
    %c0_29 = arith.constant 0 : index
    %49 = vector.load %arg10[%c0_27, %c0_28, %c0_29] : memref<10x10x16xf32, #tpu.memory_space<vmem>>, vector<10x10x16xf32>
    %cst_30 = arith.constant 0.000000e+00 : f32
    %50 = vector.broadcast %cst_30 : f32 to vector<8x8x16xf32>
    %51 = vector.extract_strided_slice %49 {offsets = [0, 0, 0], sizes = [8, 8, 16], strides = [1, 1, 1]} : vector<10x10x16xf32> to vector<8x8x16xf32>
    %c0_31 = arith.constant 0 : index
    %c0_32 = arith.constant 0 : index
    %c0_33 = arith.constant 0 : index
    %52 = vector.load %arg7[%c0_31, %c0_32, %c0_33] : memref<3x3x16xf32, #tpu.memory_space<vmem>>, vector<1x1x16xf32>
    %53 = vector.shape_cast %52 : vector<1x1x16xf32> to vector<16xf32>
    %54 = vector.shape_cast %53 : vector<16xf32> to vector<1x1x16xf32>
    %55 = vector.broadcast %54 : vector<1x1x16xf32> to vector<8x8x16xf32>
    %56 = arith.mulf %51, %55 : vector<8x8x16xf32>
    %57 = arith.addf %50, %56 : vector<8x8x16xf32>
    %58 = vector.extract_strided_slice %49 {offsets = [0, 1, 0], sizes = [8, 8, 16], strides = [1, 1, 1]} : vector<10x10x16xf32> to vector<8x8x16xf32>
    %c0_34 = arith.constant 0 : index
    %c1_35 = arith.constant 1 : index
    %c0_36 = arith.constant 0 : index
    %59 = vector.load %arg7[%c0_34, %c1_35, %c0_36] : memref<3x3x16xf32, #tpu.memory_space<vmem>>, vector<1x1x16xf32>
    %60 = vector.shape_cast %59 : vector<1x1x16xf32> to vector<16xf32>
    %61 = vector.shape_cast %60 : vector<16xf32> to vector<1x1x16xf32>
    %62 = vector.broadcast %61 : vector<1x1x16xf32> to vector<8x8x16xf32>
    %63 = arith.mulf %58, %62 : vector<8x8x16xf32>
    %64 = arith.addf %57, %63 : vector<8x8x16xf32>
    %65 = vector.extract_strided_slice %49 {offsets = [0, 2, 0], sizes = [8, 8, 16], strides = [1, 1, 1]} : vector<10x10x16xf32> to vector<8x8x16xf32>
    %c0_37 = arith.constant 0 : index
    %c2 = arith.constant 2 : index
    %c0_38 = arith.constant 0 : index
    %66 = vector.load %arg7[%c0_37, %c2, %c0_38] : memref<3x3x16xf32, #tpu.memory_space<vmem>>, vector<1x1x16xf32>
    %67 = vector.shape_cast %66 : vector<1x1x16xf32> to vector<16xf32>
    %68 = vector.shape_cast %67 : vector<16xf32> to vector<1x1x16xf32>
    %69 = vector.broadcast %68 : vector<1x1x16xf32> to vector<8x8x16xf32>
    %70 = arith.mulf %65, %69 : vector<8x8x16xf32>
    %71 = arith.addf %64, %70 : vector<8x8x16xf32>
    %72 = vector.extract_strided_slice %49 {offsets = [1, 0, 0], sizes = [8, 8, 16], strides = [1, 1, 1]} : vector<10x10x16xf32> to vector<8x8x16xf32>
    %c1_39 = arith.constant 1 : index
    %c0_40 = arith.constant 0 : index
    %c0_41 = arith.constant 0 : index
    %73 = vector.load %arg7[%c1_39, %c0_40, %c0_41] : memref<3x3x16xf32, #tpu.memory_space<vmem>>, vector<1x1x16xf32>
    %74 = vector.shape_cast %73 : vector<1x1x16xf32> to vector<16xf32>
    %75 = vector.shape_cast %74 : vector<16xf32> to vector<1x1x16xf32>
    %76 = vector.broadcast %75 : vector<1x1x16xf32> to vector<8x8x16xf32>
    %77 = arith.mulf %72, %76 : vector<8x8x16xf32>
    %78 = arith.addf %71, %77 : vector<8x8x16xf32>
    %79 = vector.extract_strided_slice %49 {offsets = [1, 1, 0], sizes = [8, 8, 16], strides = [1, 1, 1]} : vector<10x10x16xf32> to vector<8x8x16xf32>
    %c1_42 = arith.constant 1 : index
    %c1_43 = arith.constant 1 : index
    %c0_44 = arith.constant 0 : index
    %80 = vector.load %arg7[%c1_42, %c1_43, %c0_44] : memref<3x3x16xf32, #tpu.memory_space<vmem>>, vector<1x1x16xf32>
    %81 = vector.shape_cast %80 : vector<1x1x16xf32> to vector<16xf32>
    %82 = vector.shape_cast %81 : vector<16xf32> to vector<1x1x16xf32>
    %83 = vector.broadcast %82 : vector<1x1x16xf32> to vector<8x8x16xf32>
    %84 = arith.mulf %79, %83 : vector<8x8x16xf32>
    %85 = arith.addf %78, %84 : vector<8x8x16xf32>
    %86 = vector.extract_strided_slice %49 {offsets = [1, 2, 0], sizes = [8, 8, 16], strides = [1, 1, 1]} : vector<10x10x16xf32> to vector<8x8x16xf32>
    %c1_45 = arith.constant 1 : index
    %c2_46 = arith.constant 2 : index
    %c0_47 = arith.constant 0 : index
    %87 = vector.load %arg7[%c1_45, %c2_46, %c0_47] : memref<3x3x16xf32, #tpu.memory_space<vmem>>, vector<1x1x16xf32>
    %88 = vector.shape_cast %87 : vector<1x1x16xf32> to vector<16xf32>
    %89 = vector.shape_cast %88 : vector<16xf32> to vector<1x1x16xf32>
    %90 = vector.broadcast %89 : vector<1x1x16xf32> to vector<8x8x16xf32>
    %91 = arith.mulf %86, %90 : vector<8x8x16xf32>
    %92 = arith.addf %85, %91 : vector<8x8x16xf32>
    %93 = vector.extract_strided_slice %49 {offsets = [2, 0, 0], sizes = [8, 8, 16], strides = [1, 1, 1]} : vector<10x10x16xf32> to vector<8x8x16xf32>
    %c2_48 = arith.constant 2 : index
    %c0_49 = arith.constant 0 : index
    %c0_50 = arith.constant 0 : index
    %94 = vector.load %arg7[%c2_48, %c0_49, %c0_50] : memref<3x3x16xf32, #tpu.memory_space<vmem>>, vector<1x1x16xf32>
    %95 = vector.shape_cast %94 : vector<1x1x16xf32> to vector<16xf32>
    %96 = vector.shape_cast %95 : vector<16xf32> to vector<1x1x16xf32>
    %97 = vector.broadcast %96 : vector<1x1x16xf32> to vector<8x8x16xf32>
    %98 = arith.mulf %93, %97 : vector<8x8x16xf32>
    %99 = arith.addf %92, %98 : vector<8x8x16xf32>
    %100 = vector.extract_strided_slice %49 {offsets = [2, 1, 0], sizes = [8, 8, 16], strides = [1, 1, 1]} : vector<10x10x16xf32> to vector<8x8x16xf32>
    %c2_51 = arith.constant 2 : index
    %c1_52 = arith.constant 1 : index
    %c0_53 = arith.constant 0 : index
    %101 = vector.load %arg7[%c2_51, %c1_52, %c0_53] : memref<3x3x16xf32, #tpu.memory_space<vmem>>, vector<1x1x16xf32>
    %102 = vector.shape_cast %101 : vector<1x1x16xf32> to vector<16xf32>
    %103 = vector.shape_cast %102 : vector<16xf32> to vector<1x1x16xf32>
    %104 = vector.broadcast %103 : vector<1x1x16xf32> to vector<8x8x16xf32>
    %105 = arith.mulf %100, %104 : vector<8x8x16xf32>
    %106 = arith.addf %99, %105 : vector<8x8x16xf32>
    %107 = vector.extract_strided_slice %49 {offsets = [2, 2, 0], sizes = [8, 8, 16], strides = [1, 1, 1]} : vector<10x10x16xf32> to vector<8x8x16xf32>
    %c2_54 = arith.constant 2 : index
    %c2_55 = arith.constant 2 : index
    %c0_56 = arith.constant 0 : index
    %108 = vector.load %arg7[%c2_54, %c2_55, %c0_56] : memref<3x3x16xf32, #tpu.memory_space<vmem>>, vector<1x1x16xf32>
    %109 = vector.shape_cast %108 : vector<1x1x16xf32> to vector<16xf32>
    %110 = vector.shape_cast %109 : vector<16xf32> to vector<1x1x16xf32>
    %111 = vector.broadcast %110 : vector<1x1x16xf32> to vector<8x8x16xf32>
    %112 = arith.mulf %107, %111 : vector<8x8x16xf32>
    %113 = arith.addf %106, %112 : vector<8x8x16xf32>
    %cst_57 = arith.constant 5.000000e-01 : f32
    %114 = vector.broadcast %cst_57 : f32 to vector<8x8x16xf32>
    %115 = arith.mulf %114, %113 : vector<8x8x16xf32>
    %cst_58 = arith.constant 0.707106769 : f32
    %116 = vector.broadcast %cst_58 : f32 to vector<8x8x16xf32>
    %117 = arith.mulf %113, %116 : vector<8x8x16xf32>
    %118 = math.erf %117 : vector<8x8x16xf32>
    %cst_59 = arith.constant 1.000000e+00 : f32
    %119 = vector.broadcast %cst_59 : f32 to vector<8x8x16xf32>
    %120 = arith.addf %119, %118 : vector<8x8x16xf32>
    %121 = arith.mulf %115, %120 : vector<8x8x16xf32>
    %c1_60 = arith.constant 1 : index
    %c1_61 = arith.constant 1 : index
    %c0_62 = arith.constant 0 : index
    %122 = vector.load %arg10[%c1_60, %c1_61, %c0_62] : memref<10x10x16xf32, #tpu.memory_space<vmem>>, vector<8x8x16xf32>
    tpu.vector_store %arg10[%c1_60, %c1_61, %c0_62], %121 {strides = array<i32>} : memref<10x10x16xf32, #tpu.memory_space<vmem>>, vector<8x8x16xf32>,
    %c0_63 = arith.constant 0 : index
    %c0_64 = arith.constant 0 : index
    %c0_65 = arith.constant 0 : index
    %123 = vector.load %arg10[%c0_63, %c0_64, %c0_65] : memref<10x10x16xf32, #tpu.memory_space<vmem>>, vector<10x10x16xf32>
    %cst_66 = arith.constant 0.000000e+00 : f32
    %124 = vector.broadcast %cst_66 : f32 to vector<8x8x16xf32>
    %125 = vector.extract_strided_slice %123 {offsets = [0, 0, 0], sizes = [8, 8, 16], strides = [1, 1, 1]} : vector<10x10x16xf32> to vector<8x8x16xf32>
    %c0_67 = arith.constant 0 : index
    %c0_68 = arith.constant 0 : index
    %c0_69 = arith.constant 0 : index
    %126 = vector.load %arg8[%c0_67, %c0_68, %c0_69] : memref<3x3x16xf32, #tpu.memory_space<vmem>>, vector<1x1x16xf32>
    %127 = vector.shape_cast %126 : vector<1x1x16xf32> to vector<16xf32>
    %128 = vector.shape_cast %127 : vector<16xf32> to vector<1x1x16xf32>
    %129 = vector.broadcast %128 : vector<1x1x16xf32> to vector<8x8x16xf32>
    %130 = arith.mulf %125, %129 : vector<8x8x16xf32>
    %131 = arith.addf %124, %130 : vector<8x8x16xf32>
    %132 = vector.extract_strided_slice %123 {offsets = [0, 1, 0], sizes = [8, 8, 16], strides = [1, 1, 1]} : vector<10x10x16xf32> to vector<8x8x16xf32>
    %c0_70 = arith.constant 0 : index
    %c1_71 = arith.constant 1 : index
    %c0_72 = arith.constant 0 : index
    %133 = vector.load %arg8[%c0_70, %c1_71, %c0_72] : memref<3x3x16xf32, #tpu.memory_space<vmem>>, vector<1x1x16xf32>
    %134 = vector.shape_cast %133 : vector<1x1x16xf32> to vector<16xf32>
    %135 = vector.shape_cast %134 : vector<16xf32> to vector<1x1x16xf32>
    %136 = vector.broadcast %135 : vector<1x1x16xf32> to vector<8x8x16xf32>
    %137 = arith.mulf %132, %136 : vector<8x8x16xf32>
    %138 = arith.addf %131, %137 : vector<8x8x16xf32>
    %139 = vector.extract_strided_slice %123 {offsets = [0, 2, 0], sizes = [8, 8, 16], strides = [1, 1, 1]} : vector<10x10x16xf32> to vector<8x8x16xf32>
    %c0_73 = arith.constant 0 : index
    %c2_74 = arith.constant 2 : index
    %c0_75 = arith.constant 0 : index
    %140 = vector.load %arg8[%c0_73, %c2_74, %c0_75] : memref<3x3x16xf32, #tpu.memory_space<vmem>>, vector<1x1x16xf32>
    %141 = vector.shape_cast %140 : vector<1x1x16xf32> to vector<16xf32>
    %142 = vector.shape_cast %141 : vector<16xf32> to vector<1x1x16xf32>
    %143 = vector.broadcast %142 : vector<1x1x16xf32> to vector<8x8x16xf32>
    %144 = arith.mulf %139, %143 : vector<8x8x16xf32>
    %145 = arith.addf %138, %144 : vector<8x8x16xf32>
    %146 = vector.extract_strided_slice %123 {offsets = [1, 0, 0], sizes = [8, 8, 16], strides = [1, 1, 1]} : vector<10x10x16xf32> to vector<8x8x16xf32>
    %c1_76 = arith.constant 1 : index
    %c0_77 = arith.constant 0 : index
    %c0_78 = arith.constant 0 : index
    %147 = vector.load %arg8[%c1_76, %c0_77, %c0_78] : memref<3x3x16xf32, #tpu.memory_space<vmem>>, vector<1x1x16xf32>
    %148 = vector.shape_cast %147 : vector<1x1x16xf32> to vector<16xf32>
    %149 = vector.shape_cast %148 : vector<16xf32> to vector<1x1x16xf32>
    %150 = vector.broadcast %149 : vector<1x1x16xf32> to vector<8x8x16xf32>
    %151 = arith.mulf %146, %150 : vector<8x8x16xf32>
    %152 = arith.addf %145, %151 : vector<8x8x16xf32>
    %153 = vector.extract_strided_slice %123 {offsets = [1, 1, 0], sizes = [8, 8, 16], strides = [1, 1, 1]} : vector<10x10x16xf32> to vector<8x8x16xf32>
    %c1_79 = arith.constant 1 : index
    %c1_80 = arith.constant 1 : index
    %c0_81 = arith.constant 0 : index
    %154 = vector.load %arg8[%c1_79, %c1_80, %c0_81] : memref<3x3x16xf32, #tpu.memory_space<vmem>>, vector<1x1x16xf32>
    %155 = vector.shape_cast %154 : vector<1x1x16xf32> to vector<16xf32>
    %156 = vector.shape_cast %155 : vector<16xf32> to vector<1x1x16xf32>
    %157 = vector.broadcast %156 : vector<1x1x16xf32> to vector<8x8x16xf32>
    %158 = arith.mulf %153, %157 : vector<8x8x16xf32>
    %159 = arith.addf %152, %158 : vector<8x8x16xf32>
    %160 = vector.extract_strided_slice %123 {offsets = [1, 2, 0], sizes = [8, 8, 16], strides = [1, 1, 1]} : vector<10x10x16xf32> to vector<8x8x16xf32>
    %c1_82 = arith.constant 1 : index
    %c2_83 = arith.constant 2 : index
    %c0_84 = arith.constant 0 : index
    %161 = vector.load %arg8[%c1_82, %c2_83, %c0_84] : memref<3x3x16xf32, #tpu.memory_space<vmem>>, vector<1x1x16xf32>
    %162 = vector.shape_cast %161 : vector<1x1x16xf32> to vector<16xf32>
    %163 = vector.shape_cast %162 : vector<16xf32> to vector<1x1x16xf32>
    %164 = vector.broadcast %163 : vector<1x1x16xf32> to vector<8x8x16xf32>
    %165 = arith.mulf %160, %164 : vector<8x8x16xf32>
    %166 = arith.addf %159, %165 : vector<8x8x16xf32>
    %167 = vector.extract_strided_slice %123 {offsets = [2, 0, 0], sizes = [8, 8, 16], strides = [1, 1, 1]} : vector<10x10x16xf32> to vector<8x8x16xf32>
    %c2_85 = arith.constant 2 : index
    %c0_86 = arith.constant 0 : index
    %c0_87 = arith.constant 0 : index
    %168 = vector.load %arg8[%c2_85, %c0_86, %c0_87] : memref<3x3x16xf32, #tpu.memory_space<vmem>>, vector<1x1x16xf32>
    %169 = vector.shape_cast %168 : vector<1x1x16xf32> to vector<16xf32>
    %170 = vector.shape_cast %169 : vector<16xf32> to vector<1x1x16xf32>
    %171 = vector.broadcast %170 : vector<1x1x16xf32> to vector<8x8x16xf32>
    %172 = arith.mulf %167, %171 : vector<8x8x16xf32>
    %173 = arith.addf %166, %172 : vector<8x8x16xf32>
    %174 = vector.extract_strided_slice %123 {offsets = [2, 1, 0], sizes = [8, 8, 16], strides = [1, 1, 1]} : vector<10x10x16xf32> to vector<8x8x16xf32>
    %c2_88 = arith.constant 2 : index
    %c1_89 = arith.constant 1 : index
    %c0_90 = arith.constant 0 : index
    %175 = vector.load %arg8[%c2_88, %c1_89, %c0_90] : memref<3x3x16xf32, #tpu.memory_space<vmem>>, vector<1x1x16xf32>
    %176 = vector.shape_cast %175 : vector<1x1x16xf32> to vector<16xf32>
    %177 = vector.shape_cast %176 : vector<16xf32> to vector<1x1x16xf32>
    %178 = vector.broadcast %177 : vector<1x1x16xf32> to vector<8x8x16xf32>
    %179 = arith.mulf %174, %178 : vector<8x8x16xf32>
    %180 = arith.addf %173, %179 : vector<8x8x16xf32>
    %181 = vector.extract_strided_slice %123 {offsets = [2, 2, 0], sizes = [8, 8, 16], strides = [1, 1, 1]} : vector<10x10x16xf32> to vector<8x8x16xf32>
    %c2_91 = arith.constant 2 : index
    %c2_92 = arith.constant 2 : index
    %c0_93 = arith.constant 0 : index
    %182 = vector.load %arg8[%c2_91, %c2_92, %c0_93] : memref<3x3x16xf32, #tpu.memory_space<vmem>>, vector<1x1x16xf32>
    %183 = vector.shape_cast %182 : vector<1x1x16xf32> to vector<16xf32>
    %184 = vector.shape_cast %183 : vector<16xf32> to vector<1x1x16xf32>
    %185 = vector.broadcast %184 : vector<1x1x16xf32> to vector<8x8x16xf32>
    %186 = arith.mulf %181, %185 : vector<8x8x16xf32>
    %187 = arith.addf %180, %186 : vector<8x8x16xf32>
    %188 = vector.shape_cast %187 : vector<8x8x16xf32> to vector<64x16xf32>
    %189 = arith.addf %44, %188 : vector<64x16xf32>
    %190 = arith.addf %189, %1 : vector<64x16xf32>
    %c0_94 = arith.constant 0 : index
    %c0_95 = arith.constant 0 : index
    %c0_96 = arith.constant 0 : index
    %191 = vector.load %arg9[%c0_94, %c0_95, %c0_96] : memref<1x64x16xf32, #tpu.memory_space<vmem>>, vector<1x64x16xf32>
    %192 = vector.shape_cast %191 : vector<1x64x16xf32> to vector<64x16xf32>
    %193 = vector.shape_cast %190 : vector<64x16xf32> to vector<1x64x16xf32>
    tpu.vector_store %arg9[%c0_94, %c0_95, %c0_96], %193 {strides = array<i32>} : memref<1x64x16xf32, #tpu.memory_space<vmem>>, vector<1x64x16xf32>,
    return
  }
  func.func @transform_0(%arg0: i32) -> (i32, i32, i32) {
    %c0_i32 = arith.constant 0 : i32
    %c0_i32_0 = arith.constant 0 : i32
    %c0_i32_1 = arith.constant 0 : i32
    return %arg0, %c0_i32, %c0_i32_0 : i32, i32, i32
  }
  func.func @transform_1(%arg0: i32) -> (i32, i32) {
    %c0_i32 = arith.constant 0 : i32
    %c0_i32_0 = arith.constant 0 : i32
    %c0_i32_1 = arith.constant 0 : i32
    return %c0_i32, %c0_i32_0 : i32, i32
  }
  func.func @transform_2(%arg0: i32) -> (i32, i32) {
    %c0_i32 = arith.constant 0 : i32
    %c0_i32_0 = arith.constant 0 : i32
    %c0_i32_1 = arith.constant 0 : i32
    return %c0_i32, %c0_i32_0 : i32, i32
  }
  func.func @transform_3(%arg0: i32) -> (i32, i32) {
    %c0_i32 = arith.constant 0 : i32
    %c0_i32_0 = arith.constant 0 : i32
    %c0_i32_1 = arith.constant 0 : i32
    return %c0_i32, %c0_i32_0 : i32, i32
  }
  func.func @transform_4(%arg0: i32) -> (i32, i32) {
    %c0_i32 = arith.constant 0 : i32
    %c0_i32_0 = arith.constant 0 : i32
    %c0_i32_1 = arith.constant 0 : i32
    return %c0_i32, %c0_i32_0 : i32, i32
  }
  func.func @transform_5(%arg0: i32) -> (i32, i32) {
    %c0_i32 = arith.constant 0 : i32
    %c0_i32_0 = arith.constant 0 : i32
    %c0_i32_1 = arith.constant 0 : i32
    return %c0_i32, %c0_i32_0 : i32, i32
  }
  func.func @transform_6(%arg0: i32) -> (i32, i32, i32) {
    %c0_i32 = arith.constant 0 : i32
    %c0_i32_0 = arith.constant 0 : i32
    %c0_i32_1 = arith.constant 0 : i32
    %c0_i32_2 = arith.constant 0 : i32
    return %c0_i32, %c0_i32_0, %c0_i32_1 : i32, i32, i32
  }
  func.func @transform_7(%arg0: i32) -> (i32, i32, i32) {
    %c0_i32 = arith.constant 0 : i32
    %c0_i32_0 = arith.constant 0 : i32
    %c0_i32_1 = arith.constant 0 : i32
    %c0_i32_2 = arith.constant 0 : i32
    return %c0_i32, %c0_i32_0, %c0_i32_1 : i32, i32, i32
  }
  func.func @transform_8(%arg0: i32) -> (i32, i32, i32) {
    %c0_i32 = arith.constant 0 : i32
    %c0_i32_0 = arith.constant 0 : i32
    %c0_i32_1 = arith.constant 0 : i32
    return %arg0, %c0_i32, %c0_i32_0 : i32, i32, i32
  }
}

</mosaic_0001>

<bundles_post_ra>
// kernel: tpu_custom_call.1
= control target key start
LH: loop header
LB: loop body
LE: loop exit
PB: predicated region body
PF: predicated region fallthrough
CT: control target
= control target key end

     0   :  { %s2565_s27 = smov 0   ;;  %s3547_s0 = inlined_call_operand.vmem [shape: f32[2,64,16], index: 0, kind: input, shape index: {}]   ;;  %s3548_s1 = inlined_call_operand.vmem [shape: f32[16,48], index: 1, kind: input, shape index: {}]   ;;  %s3549_s2 = inlined_call_operand.vmem [shape: f32[1,16], index: 2, kind: input, shape index: {}]   ;;  %s3550_s3 = inlined_call_operand.vmem [shape: f32[16,16], index: 3, kind: input, shape index: {}]   ;;  %s3551_s4 = inlined_call_operand.vmem [shape: f32[16,16], index: 4, kind: input, shape index: {}]   ;;  %s3552_s5 = inlined_call_operand.vmem [shape: f32[1,16], index: 5, kind: input, shape index: {}]   ;;  %s3553_s6 = inlined_call_operand.vmem [shape: f32[3,3,16], index: 6, kind: input, shape index: {}]   ;;  %s3554_s7 = inlined_call_operand.vmem [shape: f32[3,3,16], index: 7, kind: input, shape index: {}]   ;;  %s3555_s8 = inlined_call_operand.vmem [shape: f32[2,64,16], index: 8, kind: output, shape index: {}]  }
   0x1 LB: > { %s2252_s28 = sadd.s32 4294967295, %s2515_s27   ;;  %p2256_p0 = scmp.ge.s32.totalorder %s2515_s27, 1  ;;  %s2515_s27 = sphi %s2565_s27, %s18_s27  }
   0x2   : > { %p262_p1 = scmp.lt.s32.totalorder %s2515_s27, 3 }
   0x4   : > { %p263_p2 = pnand %p2256_p0, %p262_p1 }
   0x5   : > { %v314_v0 = vld [vmem:[%s3548_s1] sm:$0xff] (!%p263_p2)  ;;  %v315_v1 = vld [vmem:[%s3548_s1 + $0x8] sm:$0xff] (!%p263_p2)  ;;  %p296_p3 = scmp.lt.s32.totalorder (!%p263_p2), %s2252_s28, 1  ;;  %vm316_vm0 = vcmask (!%p263_p2), 130048   ;;  %vm485_vm1 = vcmask (!%p263_p2), 261248   ;;  %s2517_s17 = smov (!%p263_p2), 112  }
   0x6   : > { %266 = sbr.rel (%p263_p2) target bundleno = 1550 (0x60e), region = 52  ;;  %v2432_v2 = vpack.c.bf16 (!%p263_p2), %v315_v1, %v314_v0  ;;  %vm992_vm2 = vcmask (!%p263_p2), 123904   ;;  %s2519_s18 = smov (!%p263_p2), 96   ;;  %vm598_vm3 = vcmask (!%p263_p2), 523264   ;;  %vm1107_vm4 = vcmask (!%p263_p2), 1046528   ;;  %vm3011_vm6 = vmpackc.low (!%p263_p2), %vm316_vm0, %vm316_vm0 }
   0x7   : > { %vm1185_vm5 = vcmask (!%p263_p2), 1045504  }
   0x8   : > { %2433 = vmatprep.subr.bf16.mxu0 (!%p263_p2), %v2432_v2 }
   0x9   : > { %2435 = vmatpush3.bf16.msra.mxu0 (!%p263_p2), %v2432_v2 }
   0xd   : > { %s3559_s28 = smov (!%p296_p3, %s2252_s28), 1 }
   0xe   : > { %s2323_s11 = sshll.u32 %s3559_s28, 6 }
   0xf   : > { %s2587_s14 = scalar_lea.vmem %s3547_s0, %s2323_s11  ;;  %s3495_s12 = scalar_lea.vmem %s3555_s8, %s2323_s11 }
  0x10   : > { %v306_v3 = vld [vmem:[%s2587_s14] sm:$0xff]  ;;  %v307_v4 = vld [vmem:[%s2587_s14 + $0x8] sm:$0xff]  ;;  %v308_v5 = vld [vmem:[%s2587_s14 + $0x10] sm:$0xff] }
  0x11   : > { %2369 = vmatprep.mubr.msk.f32.mxu0 %vm316_vm0, %v306_v3  ;;  %v309_v6 = vld [vmem:[%s2587_s14 + $0x18] sm:$0xff]  ;;  %v310_v7 = vld [vmem:[%s2587_s14 + $0x20] sm:$0xff]  ;;  %v311_v8 = vld [vmem:[%s2587_s14 + $0x28] sm:$0xff] }
  0x12   : > { %2370 = vmatmul.mubr.msk.f32.vlgmr.msra.gmra.mrb[0].mxu0 %vm316_vm0, %v307_v4  ;;  %v312_v9 = vld [vmem:[%s2587_s14 + $0x30] sm:$0xff]  ;;  %v313_v10 = vld [vmem:[%s2587_s14 + $0x38] sm:$0xff] }
  0x13   : > { %2372 = vmatprep.mubr.msk.f32.mxu0 %vm316_vm0, %v308_v5 }
  0x16   : > { %2373 = vmatmul.mubr.msk.f32.gmra.mrb[2].mxu0 %vm316_vm0, %v309_v6 }
  0x17   : > { %2375 = vmatprep.mubr.msk.f32.mxu0 %vm316_vm0, %v310_v7 }
  0x1a   : > { %2376 = vmatmul.mubr.msk.f32.gmra.mrb[4].mxu0 %vm316_vm0, %v311_v8  ;;  %v2269_v8 = vld [vmem:[%s3549_s2] ss:$0 sm:$0xff] }
  0x1b   : > { %2378 = vmatprep.mubr.msk.f32.mxu0 %vm316_vm0, %v312_v9 }
  0x1e   : > { %2379 = vmatmul.mubr.msk.f32.gmra.mrb[6].mxu0 %vm316_vm0, %v313_v10 }
  0xe5   : > { %v2605_v11 = vpop.f32.mrb[0].mxu0 }
  0xe6   : > { %v447_v12 = vmul.f32 %v2605_v11, %v2605_v11  ;;  %v2609_v13 = vpop.f32.mrb[1].mxu0 }
  0xe7   : > { %v446_v14 = vmul.f32 %v2609_v13, %v2609_v13 }
  0xe8   : > { %v455_v15 = vsel %vm316_vm0, %v447_v12, 0.0  ;;  %v487_v16 = vsel %vm485_vm1, %v447_v12, 0.0 }
  0xe9   : > { %v454_v17 = vsel %vm316_vm0, %v446_v14, 0.0  ;;  %v486_v18 = vsel %vm485_vm1, %v446_v14, 0.0  ;;  %v2617_v19 = vpop.f32.mrb[2].mxu0 }
  0xea   : > { %v456_v20 = vadd.f32 %v455_v15, %v454_v17  ;;  %v488_v21 = vadd.f32 %v487_v16, %v486_v18  ;;  %v2619_v22 = vpop.f32.mrb[3].mxu0  ;;  %v449_v23 = vmul.f32 %v2617_v19, %v2617_v19 }
  0xeb   : > { %v448_v24 = vmul.f32 %v2619_v22, %v2619_v22 }
  0xec   : > { %v459_v31 = vsel %vm316_vm0, %v449_v23, 0.0  ;;  %v491_v32 = vsel %vm485_vm1, %v449_v23, 0.0 }
  0xed   : > { %v457_v25 = vsel %vm316_vm0, %v448_v24, 0.0  ;;  %v489_v26 = vsel %vm485_vm1, %v448_v24, 0.0  ;;  %v2627_v27 = vpop.f32.mrb[4].mxu0 }
  0xee   : > { %v458_v28 = vadd.f32 %v457_v25, %v456_v20  ;;  %v490_v29 = vadd.f32 %v489_v26, %v488_v21  ;;  %v2629_v30 = vpop.f32.mrb[5].mxu0  ;;  %v451_v33 = vmul.f32 %v2627_v27, %v2627_v27 }
  0xef   : > { %v450_v34 = vmul.f32 %v2629_v30, %v2629_v30 }
  0xf0   : > { %v460_v35 = vadd.f32 %v459_v31, %v458_v28  ;;  %v492_v36 = vadd.f32 %v491_v32, %v490_v29  ;;  %v463_v43 = vsel %vm316_vm0, %v451_v33, 0.0  ;;  %v495_v44 = vsel %vm485_vm1, %v451_v33, 0.0 }
  0xf1   : > { %v461_v37 = vsel %vm316_vm0, %v450_v34, 0.0  ;;  %v493_v38 = vsel %vm485_vm1, %v450_v34, 0.0  ;;  %v2639_v39 = vpop.f32.mrb[6].mxu0 }
  0xf2   : > { %v462_v40 = vadd.f32 %v461_v37, %v460_v35  ;;  %v494_v41 = vadd.f32 %v493_v38, %v492_v36  ;;  %v2641_v42 = vpop.f32.mrb[7].mxu0  ;;  %v453_v45 = vmul.f32 %v2639_v39, %v2639_v39 }
  0xf3   : > { %v452_v46 = vmul.f32 %v2641_v42, %v2641_v42 }
  0xf4   : > { %v464_v47 = vadd.f32 %v463_v43, %v462_v40  ;;  %v496_v48 = vadd.f32 %v495_v44, %v494_v41  ;;  %v467_v53 = vsel %vm316_vm0, %v453_v45, 0.0  ;;  %v499_v54 = vsel %vm485_vm1, %v453_v45, 0.0 }
  0xf5   : > { %v465_v49 = vsel %vm316_vm0, %v452_v46, 0.0  ;;  %v497_v50 = vsel %vm485_vm1, %v452_v46, 0.0 }
  0xf6   : > { %v466_v51 = vadd.f32 %v465_v49, %v464_v47  ;;  %v498_v52 = vadd.f32 %v497_v50, %v496_v48  ;;  %v2518_v49 = vmov 0.0  }
  0xf7   : > { %996 = vst.msk [vmem:[#allocation2 + $0x20] sm:$0xff] %vm316_vm0, %v2518_v49  ;;  %991 = vst.msk [vmem:[#allocation2] sm:$0xff] %vm316_vm0, %v2518_v49 }
  0xf8   : > { %v468_v55 = vadd.f32 %v467_v53, %v466_v51  ;;  %v500_v56 = vadd.f32 %v499_v54, %v498_v52  ;;  %997 = vst.msk [vmem:[#allocation2 + $0x28] sm:$0x3] %vm992_vm2, %v2518_v49  ;;  %993 = vst.msk [vmem:[#allocation2 + $0x8] sm:$0x3] %vm992_vm2, %v2518_v49 }
  0xf9   : > { %994 = vst.msk [vmem:[#allocation2 + $0x10] sm:$0xff] %vm316_vm0, %v2518_v49  ;;  %998 = vst.msk [vmem:[#allocation2 + $0x30] sm:$0xff] %vm316_vm0, %v2518_v49 }
  0xfa   : > { %v469_v57 = vrot.slane %v468_v55, 4  ;;  %v501_v58 = vrot.slane %v500_v56, 4  ;;  %995 = vst.msk [vmem:[#allocation2 + $0x18] sm:$0x3] %vm992_vm2, %v2518_v49  ;;  %999 = vst.msk [vmem:[#allocation2 + $0x38] sm:$0x3] %vm992_vm2, %v2518_v49 }
  0xfb   : > { %1000 = vst.msk [vmem:[#allocation2 + $0x40] sm:$0xff] %vm316_vm0, %v2518_v49  ;;  %1002 = vst.msk [vmem:[#allocation2 + $0x50] sm:$0xff] %vm316_vm0, %v2518_v49 }
  0xfc   : > { %v470_v59 = vadd.f32 %v469_v57, %v468_v55  ;;  %v502_v60 = vadd.f32 %v501_v58, %v500_v56  ;;  %1001 = vst.msk [vmem:[#allocation2 + $0x48] sm:$0x3] %vm992_vm2, %v2518_v49  ;;  %1003 = vst.msk [vmem:[#allocation2 + $0x58] sm:$0x3] %vm992_vm2, %v2518_v49  ;;  %v532_v58 = vld [vmem:[%s3550_s3] sm:$0xff] }
  0xfd   : > { %1004 = vst.msk [vmem:[#allocation2 + $0x60] sm:$0xff] %vm316_vm0, %v2518_v49  ;;  %1006 = vst.msk [vmem:[#allocation2 + $0x70] sm:$0xff] %vm316_vm0, %v2518_v49 }
  0xfe   : > { %v471_v61 = vrot.slane %v470_v59, 2  ;;  %v503_v62 = vrot.slane %v502_v60, 2  ;;  %1005 = vst.msk [vmem:[#allocation2 + $0x68] sm:$0x3] %vm992_vm2, %v2518_v49  ;;  %1007 = vst.msk [vmem:[#allocation2 + $0x78] sm:$0x3] %vm992_vm2, %v2518_v49 }
  0xff   : > { %1008 = vst.msk [vmem:[#allocation2 + $0x80] sm:$0xff] %vm316_vm0, %v2518_v49  ;;  %1010 = vst.msk [vmem:[#allocation2 + $0x90] sm:$0xff] %vm316_vm0, %v2518_v49 }
 0x100   : > { %v472_v63 = vadd.f32 %v471_v61, %v470_v59  ;;  %v504_v0 = vadd.f32 %v503_v62, %v502_v60  ;;  %1009 = vst.msk [vmem:[#allocation2 + $0x88] sm:$0x3] %vm992_vm2, %v2518_v49  ;;  %1011 = vst.msk [vmem:[#allocation2 + $0x98] sm:$0x3] %vm992_vm2, %v2518_v49  ;;  %v533_v60 = vld [vmem:[%s3550_s3 + $0x8] sm:$0xff] }
 0x102   : > { %v473_v1 = vrot.slane %v472_v63, 1  ;;  %v505_v2 = vrot.slane %v504_v0, 1 }
 0x104   : > { %v474_v3 = vadd.f32 %v473_v1, %v472_v63  ;;  %v506_v4 = vadd.f32 %v505_v2, %v504_v0  ;;  %v1029_v1 = vld [vmem:[#allocation2] sm:$0xff]  ;;  %v1030_v2 = vld [vmem:[#allocation2 + $0x8] sm:$0x3] }
 0x106   : > { %v475_v5 = vmax.f32 %v474_v3, 1e-24  ;;  %v507_v6 = vmax.f32 %v506_v4, 1e-24  ;;  %v2713_v3 = vld [vmem:[%s3553_s6 + $0x1] ss:$0 sm:$0xff] }
 0x108   : > { %2473 = vrsqrt.f32 %v475_v5  ;;  %v1075_v5 = vmul.f32 %v2713_v3, %v1029_v1 }
 0x109   : > { %2475 = vrsqrt.f32 %v507_v6  ;;  %v1076_v6 = vmul.f32 %v2713_v3, %v1030_v2 }
 0x112   : > { %v2474_v7 = vpop.eup %2473 }
 0x113   : > { %v2476_v9 = vpop.eup %2475  ;;  %v483_v10 = vmul.f32 %v2474_v7, %v2641_v42  ;;  %v477_v12 = vmul.f32 %v2474_v7, %v2609_v13  ;;  %v478_v14 = vmul.f32 %v2474_v7, %v2605_v11  ;;  %v479_v15 = vmul.f32 %v2474_v7, %v2619_v22 }
 0x114   : > { %v511_v16 = vmul.f32 %v2476_v9, %v2619_v22  ;;  %v509_v17 = vmul.f32 %v2476_v9, %v2609_v13  ;;  %v512_v18 = vmul.f32 %v2476_v9, %v2617_v19  ;;  %v510_v20 = vmul.f32 %v2476_v9, %v2605_v11 }
 0x115   : > { %v524_v21 = vmul.f32 %v2269_v8, %v477_v12  ;;  %v525_v23 = vmul.f32 %v2269_v8, %v478_v14  ;;  %v480_v24 = vmul.f32 %v2474_v7, %v2617_v19  ;;  %v526_v25 = vmul.f32 %v2269_v8, %v479_v15  ;;  %v2727_v12 = vld [vmem:[%s3553_s6] ss:$0 sm:$0xff] }
 0x116   : > { %546 = vrot.lane.b32.xlu1 %v511_v16, %s2517_s17  ;;  %542 = vrot.lane.b32.xlu0 %v509_v17, %s2517_s17  ;;  %v514_v26 = vmul.f32 %v2476_v9, %v2627_v27  ;;  %v513_v28 = vmul.f32 %v2476_v9, %v2629_v30  ;;  %v481_v29 = vmul.f32 %v2474_v7, %v2629_v30  ;;  %v2735_v16 = vld [vmem:[%s3553_s6 + $0x5] ss:$0 sm:$0xff] }
 0x117   : > { %v2436_v31 = vpack.c.bf16 %v525_v23, %v524_v21  ;;  %v527_v32 = vmul.f32 %v2269_v8, %v480_v24  ;;  %v482_v33 = vmul.f32 %v2474_v7, %v2627_v27  ;;  %v516_v34 = vmul.f32 %v2476_v9, %v2639_v39 }
 0x118   : > { %v528_v35 = vmul.f32 %v2269_v8, %v481_v29  ;;  %v515_v36 = vmul.f32 %v2476_v9, %v2641_v42  ;;  %v484_v37 = vmul.f32 %v2474_v7, %v2639_v39  ;;  %v530_v38 = vmul.f32 %v2269_v8, %v483_v10  ;;  %v2720_v7 = vld [vmem:[%s3553_s6 + $0x2] ss:$0 sm:$0xff]  ;;  %v2749_v29 = vld [vmem:[%s3553_s6 + $0x6] ss:$0 sm:$0xff] }
 0x119   : > { %2437 = vmatprep.subr.bf16.mxu1 %v2436_v31  ;;  %v2440_v40 = vpack.c.bf16 %v527_v32, %v526_v25  ;;  %v529_v41 = vmul.f32 %v2269_v8, %v482_v33  ;;  %v1153_v9 = vmul.f32 %v2720_v7, %v1029_v1  ;;  %v1154_v10 = vmul.f32 %v2720_v7, %v1030_v2  ;;  %v2757_v33 = vld [vmem:[%s3553_s6 + $0x9] ss:$0 sm:$0xff] }
 0x11a   : > { %548 = vrot.lane.b32.xlu1 %v512_v18, %s2517_s17  ;;  %544 = vrot.lane.b32.xlu0 %v510_v20, %s2517_s17  ;;  %v531_v43 = vmul.f32 %v2269_v8, %v484_v37  ;;  %v1108_v8 = vrot.slane %v1075_v5, 1  ;;  %v1054_v15 = vmul.f32 %v2727_v12, %v1029_v1 }
 0x11b   : > { %2439 = vmatpush3.bf16.msra.mxu1 %v2436_v31  ;;  %v2444_v44 = vpack.c.bf16 %v529_v41, %v528_v35  ;;  %v1186_v20 = vrot.slane %v1153_v9, 2  ;;  %v1187_v21 = vrot.slane %v1154_v10, 2 }
 0x11c   : > { %2441 = vmatprep.subr.bf16.mxu1 %v2440_v40  ;;  %v2448_v45 = vpack.c.bf16 %v531_v43, %v530_v38 }
 0x11d   : > { %v1188_v32 = vsel %vm1185_vm5, %v1186_v20, %v1187_v21 }
 0x11e   : > { %552 = vrot.lane.b32.xlu1 %v514_v26, %s2517_s17  ;;  %550 = vrot.lane.b32.xlu0 %v513_v28, %s2517_s17 }
 0x11f   : > { %2443 = vmatpush3.bf16.msra.mxu1 %v2440_v40 }
 0x120   : > { %2445 = vmatprep.subr.bf16.mxu1 %v2444_v44 }
 0x122   : > { %556 = vrot.lane.b32.xlu1 %v516_v34, %s2517_s17  ;;  %554 = vrot.lane.b32.xlu0 %v515_v36, %s2517_s17 }
 0x123   : > { %2447 = vmatpush3.bf16.msra.mxu1 %v2444_v44 }
 0x124   : > { %2449 = vmatprep.subr.bf16.mxu1 %v2448_v45 }
 0x127   : > { %2451 = vmatpush3.bf16.msra.mxu1 %v2448_v45 }
 0x188   : > { %v543_v46 = vpop.permute.xlu0 %542  ;;  %v547_v48 = vpop.permute.xlu1 %546 }
 0x189   : > { %566 = vxpose.xlu0.b32.start [1/8] (short) (narrow) %v543_v46, 16 }
 0x18c   : > { %v545_v47 = vpop.permute.xlu0 %544  ;;  %v549_v50 = vpop.permute.xlu1 %548 }
 0x18d   : > { %567 = vxpose.xlu0.b32.cont [2/8] (short) (narrow) %v545_v47, 16  ;;  %v2775_v47 = vld [vmem:[%s3553_s6 + $0x4] ss:$0 sm:$0xff] }
 0x190   : > { %v551_v51 = vpop.permute.xlu0 %550  ;;  %v553_v52 = vpop.permute.xlu1 %552 }
 0x191   : > { %568 = vxpose.xlu0.b32.cont [3/8] (short) (narrow) %v547_v48, 16 }
 0x194   : > { %v555_v53 = vpop.permute.xlu0 %554  ;;  %v557_v54 = vpop.permute.xlu1 %556 }
 0x195   : > { %569 = vxpose.xlu0.b32.cont [4/8] (short) (narrow) %v549_v50, 16 }
 0x199   : > { %570 = vxpose.xlu0.b32.cont [5/8] (short) (narrow) %v551_v51, 16 }
 0x19d   : > { %571 = vxpose.xlu0.b32.cont [6/8] (short) (narrow) %v553_v52, 16 }
 0x1a1   : > { %572 = vxpose.xlu0.b32.cont [7/8] (short) (narrow) %v555_v53, 16 }
 0x1a5   : > { %573 = vxpose.xlu0.b32.end [8/8] (short) (narrow) %v557_v54, 16 }
 0x1ce   : > { %712 = vrot.lane.b32.xlu0 %v2605_v11, %s2519_s18 }
 0x209   : > { %v582_v55 = vpop.trf.xlu0 }
 0x20a   : > { %2397 = vmatprep.mubr.msk.f32.mxu1 %vm598_vm3, %v582_v55 }
 0x20d   : > { %v583_v56 = vpop.trf.xlu0 }
 0x20e   : > { %2398 = vmatmul.mubr.msk.f32.vlgmr.msra.gmra.mrb[0].mxu1 %vm598_vm3, %v583_v56  ;;  %v2788_v56 = vld [vmem:[%s3553_s6 + $0xa] ss:$0 sm:$0xff] }
 0x240   : > { %v2694_v57 = vpop.permute.xlu0 %712 }
 0x241   : > { %1022 = vst.msk [vmem:[#allocation2 + $0x21] sm:$0xff] %vm316_vm0, %v2694_v57 }
 0x248   : > { %v2729_v14 = vld [vmem:[#allocation2 + $0x20] sm:$0xff]  ;;  %v2740_v23 = vld [vmem:[#allocation2 + $0x28] sm:$0x3] }
 0x249   : > { %v2744_v25 = vmul.f32 %v2735_v16, %v2729_v14  ;;  %v1256_v34 = vmul.f32 %v2735_v16, %v2740_v23  ;;  %v1332_v37 = vmul.f32 %v2749_v29, %v2729_v14  ;;  %v1333_v38 = vmul.f32 %v2749_v29, %v2740_v23 }
 0x24a   : > { %v1429_v43 = vmul.f32 %v2757_v33, %v2729_v14  ;;  %v1430_v44 = vmul.f32 %v2757_v33, %v2740_v23  ;;  %v1507_v9 = vmul.f32 %v2788_v56, %v2740_v23 }
 0x24b   : > { %v1288_v36 = vrot.slane %v2744_v25, 1  ;;  %v1289_v5 = vrot.slane %v1256_v34, 1  ;;  %v1365_v20 = vrot.slane %v1332_v37, 2  ;;  %v1366_v21 = vrot.slane %v1333_v38, 2 }
 0x24c   : > { %v1461_v25 = vrot.slane %v1429_v43, 1 }
 0x2e1   : > { %v2399_v59 = vpop.f32.mrb[0].mxu1 }
 0x2e2   : > { %v671_v11 = vpop.f32.mrb[1].mxu1  ;;  %v677_v62 = vadd.f32 %v2399_v59, %v533_v60 }
 0x2e3   : > { %v672_v61 = vadd.f32 %v671_v11, %v532_v58 }
 0x2e4   : > { %v683_v0 = vsel %vm316_vm0, %v677_v62, -inf }
 0x2e5   : > { %v680_v63 = vsel %vm316_vm0, %v672_v61, -inf }
 0x2e6   : > { %681 = vmax.xlane.f32.xlu1 %v680_v63 }
 0x2ea   : > { %684 = vmax.xlane.f32.xlu1 %v683_v0 }
 0x2fb   : > { %710 = vrot.lane.b32.xlu1 %v2609_v13, %s2519_s18 }
 0x2ff   : > { %714 = vrot.lane.b32.xlu1 %v2619_v22, %s2519_s18  ;;  %v1109_v22 = vrot.slane %v1076_v6, 1  ;;  %v1506_v6 = vmul.f32 %v2788_v56, %v2729_v14 }
 0x301   : > { %v1110_v18 = vsel %vm1107_vm4, %v1108_v8, %v1109_v22  ;;  %v2799_v22 = vld [vmem:[%s3553_s6 + $0x8] ss:$0 sm:$0xff] }
 0x302   : > { %v1140_v28 = vadd.f32 %v1110_v18, %v1054_v15  ;;  %v1233_v18 = vmul.f32 %v2775_v47, %v2729_v14 }
 0x304   : > { %v1218_v41 = vadd.f32 %v1188_v32, %v1140_v28  ;;  %v1408_v32 = vmul.f32 %v2799_v22, %v2729_v14 }
 0x373   : > { %v682_v4 = vpop.xlane.xlu1 %681 }
 0x374   : > { %v686_v24 = vsub.f32 %v672_v61, %v682_v4 }
 0x376   : > { %v688_v35 = vmul.f32 1.442695, %v686_v24 }
 0x377   : > { %v685_v13 = vpop.xlane.xlu1 %684 }
 0x378   : > { %v687_v26 = vsub.f32 %v677_v62, %v685_v13 }
 0x37a   : > { %v690_v40 = vmul.f32 1.442695, %v687_v26  ;;  %v1462_v26 = vrot.slane %v1430_v44, 1 }
 0x37b   : > { %v711_v17 = vpop.permute.xlu1 %710 }
 0x37c   : > { %1021 = vst.msk [vmem:[#allocation2 + $0x11] sm:$0xff] %vm316_vm0, %v711_v17  ;;  %2404 = vmatprep.mubr.msk.f32.mxu0 %vm316_vm0, %v711_v17  ;;  %2477 = vpow2.f32 %v690_v40  ;;  %v1463_v43 = vsel %vm1107_vm4, %v1461_v25, %v1462_v26  ;;  %v853_v26 = vld [vmem:[%s3551_s4] sm:$0xff] }
 0x37d   : > { %2479 = vpow2.f32 %v688_v35  ;;  %v1367_v35 = vsel %vm1185_vm5, %v1365_v20, %v1366_v21 }
 0x37f   : > { %v2751_v31 = vpop.permute.xlu1 %714 }
 0x380   : > { %1023 = vst.msk [vmem:[#allocation2 + $0x31] sm:$0xff] %vm316_vm0, %v2751_v31 }
 0x383   : > { %v1031_v45 = vld [vmem:[#allocation2 + $0x10] sm:$0xff]  ;;  %v1032_v46 = vld [vmem:[#allocation2 + $0x18] sm:$0x3] }
 0x384   : > { %v1055_v48 = vmul.f32 %v2727_v12, %v1031_v45  ;;  %v1077_v49 = vmul.f32 %v2713_v3, %v1031_v45  ;;  %v1078_v50 = vmul.f32 %v2713_v3, %v1032_v46  ;;  %v1155_v51 = vmul.f32 %v2720_v7, %v1031_v45 }
 0x385   : > { %v1156_v52 = vmul.f32 %v2720_v7, %v1032_v46  ;;  %v1232_v53 = vmul.f32 %v2775_v47, %v1031_v45  ;;  %v1253_v54 = vmul.f32 %v2735_v16, %v1031_v45  ;;  %v1254_v55 = vmul.f32 %v2735_v16, %v1032_v46 }
 0x386   : > { %v1111_v58 = vrot.slane %v1077_v49, 1  ;;  %v1112_v59 = vrot.slane %v1078_v50, 1  ;;  %v1189_v60 = vrot.slane %v1155_v51, 2  ;;  %v1330_v11 = vmul.f32 %v2749_v29, %v1031_v45 }
 0x387   : > { %v1190_v61 = vrot.slane %v1156_v52, 2  ;;  %v1240_v62 = vadd.f32 %v1232_v53, %v1218_v41  ;;  %v1285_v63 = vrot.slane %v1253_v54, 1  ;;  %v1286_v0 = vrot.slane %v1254_v55, 1  ;;  %v2812_v38 = vld [vmem:[#allocation2 + $0x38] sm:$0x3]  ;;  %v2820_v52 = vpop.eup %2477 }
 0x388   : > { %v1113_v1 = vsel %vm1107_vm4, %v1111_v58, %v1112_v59  ;;  %v1331_v2 = vmul.f32 %v2749_v29, %v1032_v46  ;;  %v1362_v4 = vrot.slane %v1330_v11, 2  ;;  %v1290_v41 = vsel %vm1107_vm4, %v1288_v36, %v1289_v5 }
 0x389   : > { %v1141_v13 = vadd.f32 %v1113_v1, %v1055_v48  ;;  %v1287_v8 = vsel %vm1107_vm4, %v1285_v63, %v1286_v0  ;;  %v1191_v10 = vsel %vm1185_vm5, %v1189_v60, %v1190_v61  ;;  %v1538_v45 = vrot.slane %v1506_v6, 2  ;;  %v2810_v48 = vld [vmem:[#allocation2 + $0x30] sm:$0xff]  ;;  %v2831_v1 = vpop.eup %2479 }
 0x38a   : > { %v1317_v15 = vadd.f32 %v1287_v8, %v1240_v62  ;;  %v1363_v17 = vrot.slane %v1331_v2, 2  ;;  %v1539_v46 = vrot.slane %v1507_v9, 2  ;;  %v1409_v51 = vmul.f32 %v2799_v22, %v2810_v48 }
 0x38b   : > { %v1219_v24 = vadd.f32 %v1191_v10, %v1141_v13  ;;  %v1431_v36 = vmul.f32 %v2757_v33, %v2810_v48  ;;  %v1432_v54 = vmul.f32 %v2757_v33, %v2812_v38  ;;  %v1508_v55 = vmul.f32 %v2788_v56, %v2810_v48 }
 0x38c   : > { %v1364_v28 = vsel %vm1185_vm5, %v1362_v4, %v1363_v17  ;;  %v1540_v53 = vsel %vm1185_vm5, %v1538_v45, %v1539_v46  ;;  %v1509_v61 = vmul.f32 %v2788_v56, %v2812_v38  ;;  %v695_v0 = vsel %vm316_vm0, %v2820_v52, 0.0 }
 0x38d   : > { %v1241_v34 = vadd.f32 %v1233_v18, %v1219_v24  ;;  %v1394_v40 = vadd.f32 %v1364_v28, %v1317_v15  ;;  %v1464_v60 = vrot.slane %v1431_v36, 1  ;;  %v1465_v11 = vrot.slane %v1432_v54, 1  ;;  %696 = vadd.xlane.f32.xlu1 %v695_v0 }
 0x38e   : > { %v1541_v62 = vrot.slane %v1508_v55, 2  ;;  %v1542_v4 = vrot.slane %v1509_v61, 2  ;;  %v692_v8 = vsel %vm316_vm0, %v2831_v1, 0.0  ;;  %v1056_v46 = vmul.f32 %v2727_v12, %v2729_v14 }
 0x38f   : > { %v1318_v49 = vadd.f32 %v1290_v41, %v1241_v34  ;;  %v1416_v37 = vadd.f32 %v1408_v32, %v1394_v40  ;;  %v1466_v2 = vsel %vm1107_vm4, %v1464_v60, %v1465_v11  ;;  %v1158_v34 = vmul.f32 %v2720_v7, %v2740_v23 }
 0x390   : > { %v1543_v6 = vsel %vm1185_vm5, %v1541_v62, %v1542_v4  ;;  %v1160_v60 = vmul.f32 %v2720_v7, %v2812_v38  ;;  %v1334_v11 = vmul.f32 %v2749_v29, %v2810_v48  ;;  %v1335_v61 = vmul.f32 %v2749_v29, %v2812_v38  ;;  %v2889_v4 = vld [vmem:[#allocation2 + $0x90] sm:$0xff] }
 0x391   : > { %v1395_v44 = vadd.f32 %v1367_v35, %v1318_v49  ;;  %v1493_v50 = vadd.f32 %v1463_v43, %v1416_v37  ;;  %693 = vadd.xlane.f32.xlu1 %v692_v8  ;;  %v1193_v45 = vrot.slane %v1158_v34, 2  ;;  %v1081_v49 = vmul.f32 %v2713_v3, %v2810_v48 }
 0x392   : > { %v1082_v37 = vmul.f32 %v2713_v3, %v2812_v38  ;;  %v1257_v35 = vmul.f32 %v2735_v16, %v2810_v48  ;;  %v1258_v43 = vmul.f32 %v2735_v16, %v2812_v38  ;;  %v1196_v8 = vrot.slane %v1160_v60, 2 }
 0x393   : > { %v1570_v58 = vadd.f32 %v1540_v53, %v1493_v50  ;;  %v1417_v59 = vadd.f32 %v1409_v51, %v1395_v44  ;;  %v1234_v51 = vmul.f32 %v2775_v47, %v2810_v48  ;;  %v1368_v38 = vrot.slane %v1334_v11, 2 }
 0x394   : > { %v1118_v36 = vrot.slane %v1082_v37, 1  ;;  %v1291_v53 = vrot.slane %v1257_v35, 1  ;;  %v1292_v54 = vrot.slane %v1258_v43, 1 }
 0x395   : > { %v1586_v63 = vmul.f32 0.70710677, %v1570_v58  ;;  %v1494_v5 = vadd.f32 %v1466_v2, %v1417_v59  ;;  %v1578_v15 = vmul.f32 0.5, %v1570_v58  ;;  %v1159_v59 = vmul.f32 %v2720_v7, %v2810_v48 }
 0x396   : > { %v1293_v0 = vsel %vm1107_vm4, %v1291_v53, %v1292_v54 }
 0x397   : > { %2481 = verf.f32 %v1586_v63  ;;  %v1571_v13 = vadd.f32 %v1543_v6, %v1494_v5  ;;  %v1057_v5 = vmul.f32 %v2727_v12, %v2810_v48  ;;  %v1048_v6 = vld [vmem:[#allocation2 + $0x98] sm:$0x3]  ;;  %v2906_v48 = vmul.f32 %v2788_v56, %v2889_v4 }
 0x399   : > { %v1587_v9 = vmul.f32 0.70710677, %v1571_v13  ;;  %v1579_v21 = vmul.f32 0.5, %v1571_v13  ;;  %v1195_v13 = vrot.slane %v1159_v59, 2 }
 0x39b   : > { %2483 = verf.f32 %v1587_v9  ;;  %v1369_v9 = vrot.slane %v1335_v61, 2 }
 0x3a1   : > { %v2482_v10 = vpop.eup %2481 }
 0x3a2   : > { %v1602_v17 = vadd.f32 1.0, %v2482_v10  ;;  %716 = vrot.lane.b32.xlu1 %v2617_v19, %s2519_s18  ;;  %v854_v19 = vld [vmem:[%s3551_s4 + $0x8] sm:$0xff] }
 0x3a3   : > { %v2458_v28 = vpack.c.bf16 %v854_v19, %v853_v26  ;;  %v1370_v26 = vsel %vm1185_vm5, %v1368_v38, %v1369_v9 }
 0x3a4   : > { %v1610_v18 = vmul.f32 %v1602_v17, %v1578_v15  ;;  %v2897_v17 = vmul.f32 %v2757_v33, %v2889_v4 }
 0x3a5   : > { %v2484_v20 = vpop.eup %2483  ;;  %2459 = vmatprep.subr.bf16.mxu1 %v2458_v28 }
 0x3a6   : > { %1618 = vst.msk [vmem:[#allocation2 + $0x11] sm:$0xff] %vm316_vm0, %v1610_v18  ;;  %v1603_v24 = vadd.f32 1.0, %v2484_v20  ;;  %718 = vrot.lane.b32.xlu1 %v2629_v30, %s2519_s18  ;;  %2461 = vmatpush3.bf16.msra.mxu1 %v2458_v28  ;;  %v1080_v30 = vmul.f32 %v2713_v3, %v2740_v23  ;;  %v2902_v20 = vmul.f32 %v2757_v33, %v1048_v6 }
 0x3a8   : > { %v1611_v25 = vmul.f32 %v1603_v24, %v1579_v21  ;;  %v1115_v32 = vrot.slane %v1080_v30, 1  ;;  %v2909_v21 = vmul.f32 %v2788_v56, %v1048_v6  ;;  %v1482_v30 = vrot.slane %v2897_v17, 1 }
 0x3aa   : > { %1619 = vst.msk [vmem:[#allocation2 + $0x21] sm:$0xff] %vm316_vm0, %v1611_v25  ;;  %720 = vrot.lane.b32.xlu1 %v2627_v27, %s2519_s18  ;;  %v1079_v27 = vmul.f32 %v2713_v3, %v2729_v14  ;;  %v1197_v25 = vsel %vm1185_vm5, %v1195_v13, %v1196_v8 }
 0x3ae   : > { %722 = vrot.lane.b32.xlu1 %v2641_v42, %s2519_s18  ;;  %v1114_v42 = vrot.slane %v1079_v27, 1  ;;  %v2917_v27 = vmul.f32 %v2799_v22, %v2889_v4 }
 0x3b0   : > { %v1116_v40 = vsel %vm1107_vm4, %v1114_v42, %v1115_v32 }
 0x3b1   : > { %v1142_v44 = vadd.f32 %v1116_v40, %v1056_v46  ;;  %v1483_v40 = vrot.slane %v2902_v20, 1 }
 0x3b2   : > { %724 = vrot.lane.b32.xlu1 %v2639_v39, %s2519_s18  ;;  %v1157_v39 = vmul.f32 %v2720_v7, %v2729_v14  ;;  %v1117_v14 = vrot.slane %v1081_v49, 1 }
 0x3b4   : > { %v1192_v41 = vrot.slane %v1157_v39, 2  ;;  %v1119_v63 = vsel %vm1107_vm4, %v1117_v14, %v1118_v36 }
 0x3b5   : > { %v1143_v10 = vadd.f32 %v1119_v63, %v1057_v5 }
 0x3b6   : > { %v1194_v50 = vsel %vm1185_vm5, %v1192_v41, %v1193_v45  ;;  %v1559_v41 = vrot.slane %v2906_v48, 2  ;;  %v1560_v45 = vrot.slane %v2909_v21, 2 }
 0x3b7   : > { %v1220_v58 = vadd.f32 %v1194_v50, %v1142_v44  ;;  %v1221_v19 = vadd.f32 %v1197_v25, %v1143_v10 }
 0x3b9   : > { %v1242_v62 = vadd.f32 %v1234_v51, %v1220_v58 }
 0x3bb   : > { %v1319_v15 = vadd.f32 %v1293_v0, %v1242_v62 }
 0x3bd   : > { %v1396_v28 = vadd.f32 %v1370_v26, %v1319_v15 }
 0x41a   : > { %v697_v23 = vpop.xlane.xlu1 %696 }
 0x41b   : > { %2485 = vrcp.f32 %v697_v23 }
 0x41e   : > { %v694_v55 = vpop.xlane.xlu1 %693 }
 0x41f   : > { %2487 = vrcp.f32 %v694_v55 }
 0x422   : > { %v2887_v2 = vpop.permute.xlu1 %716 }
 0x423   : > { %1024 = vst.msk [vmem:[#allocation2 + $0x41] sm:$0xff] %vm316_vm0, %v2887_v2 }
 0x425   : > { %v2486_v24 = vpop.eup %2485 }
 0x426   : > { %v2899_v18 = vpop.permute.xlu1 %718  ;;  %v2923_v34 = vmul.f32 %v2486_v24, %v2820_v52 }
 0x427   : > { %1025 = vst.msk [vmem:[#allocation2 + $0x51] sm:$0xff] %vm316_vm0, %v2899_v18 }
 0x429   : > { %v2488_v50 = vpop.eup %2487 }
 0x42a   : > { %v1037_v42 = vld [vmem:[#allocation2 + $0x40] sm:$0xff]  ;;  %v1038_v32 = vld [vmem:[#allocation2 + $0x48] sm:$0x3]  ;;  %v2920_v39 = vpop.permute.xlu1 %720  ;;  %v2949_v8 = vmul.f32 %v2488_v50, %v2831_v1 }
 0x42b   : > { %v1058_v46 = vmul.f32 %v2727_v12, %v1037_v42  ;;  %v1083_v49 = vmul.f32 %v2713_v3, %v1037_v42  ;;  %v1084_v37 = vmul.f32 %v2713_v3, %v1038_v32  ;;  %v1161_v35 = vmul.f32 %v2720_v7, %v1037_v42  ;;  %1026 = vst.msk [vmem:[#allocation2 + $0x61] sm:$0xff] %vm316_vm0, %v2920_v39 }
 0x42c   : > { %v1162_v52 = vmul.f32 %v2720_v7, %v1038_v32  ;;  %v1235_v43 = vmul.f32 %v2775_v47, %v1037_v42  ;;  %v1259_v23 = vmul.f32 %v2735_v16, %v1037_v42  ;;  %v1260_v44 = vmul.f32 %v2735_v16, %v1038_v32 }
 0x42d   : > { %v1120_v51 = vrot.slane %v1083_v49, 1  ;;  %v1121_v14 = vrot.slane %v1084_v37, 1  ;;  %v1198_v36 = vrot.slane %v1161_v35, 2  ;;  %v1336_v53 = vmul.f32 %v2749_v29, %v1037_v42 }
 0x42e   : > { %v1199_v54 = vrot.slane %v1162_v52, 2  ;;  %v1243_v55 = vadd.f32 %v1235_v43, %v1221_v19  ;;  %v1294_v58 = vrot.slane %v1259_v23, 1  ;;  %v1295_v59 = vrot.slane %v1260_v44, 1  ;;  %v2939_v60 = vpop.permute.xlu1 %722  ;;  %v1039_v13 = vld [vmem:[#allocation2 + $0x50] sm:$0xff]  ;;  %v1040_v24 = vld [vmem:[#allocation2 + $0x58] sm:$0x3] }
 0x42f   : > { %v1122_v11 = vsel %vm1107_vm4, %v1120_v51, %v1121_v14  ;;  %v1337_v61 = vmul.f32 %v2749_v29, %v1038_v32  ;;  %v1371_v62 = vrot.slane %v1336_v53, 2  ;;  %v1410_v63 = vmul.f32 %v2799_v22, %v1037_v42  ;;  %1027 = vst.msk [vmem:[#allocation2 + $0x71] sm:$0xff] %vm316_vm0, %v2939_v60 }
 0x430   : > { %v1144_v0 = vadd.f32 %v1122_v11, %v1058_v46  ;;  %v1296_v5 = vsel %vm1107_vm4, %v1294_v58, %v1295_v59  ;;  %v1433_v6 = vmul.f32 %v2757_v33, %v1037_v42  ;;  %v1200_v38 = vsel %vm1185_vm5, %v1198_v36, %v1199_v54 }
 0x431   : > { %v1320_v9 = vadd.f32 %v1296_v5, %v1243_v55  ;;  %v1372_v10 = vrot.slane %v1337_v61, 2  ;;  %v1434_v15 = vmul.f32 %v2757_v33, %v1038_v32  ;;  %v1418_v25 = vadd.f32 %v1410_v63, %v1396_v28 }
 0x432   : > { %v1467_v26 = vrot.slane %v1433_v6, 1  ;;  %v1510_v19 = vmul.f32 %v2788_v56, %v1037_v42  ;;  %v1511_v46 = vmul.f32 %v2788_v56, %v1038_v32  ;;  %v2955_v49 = vpop.permute.xlu1 %724  ;;  %v1222_v37 = vadd.f32 %v1200_v38, %v1144_v0 }
 0x433   : > { %v1373_v35 = vsel %vm1185_vm5, %v1371_v62, %v1372_v10  ;;  %v1468_v1 = vrot.slane %v1434_v15, 1  ;;  %v1085_v52 = vmul.f32 %v2713_v3, %v1039_v13  ;;  %1028 = vst.msk [vmem:[#allocation2 + $0x81] sm:$0xff] %vm316_vm0, %v2955_v49  ;;  %v1059_v28 = vmul.f32 %v2727_v12, %v1039_v13 }
 0x434   : > { %v1544_v43 = vrot.slane %v1510_v19, 2  ;;  %v1545_v23 = vrot.slane %v1511_v46, 2  ;;  %v1086_v44 = vmul.f32 %v2713_v3, %v1040_v24  ;;  %v1163_v50 = vmul.f32 %v2720_v7, %v1039_v13 }
 0x435   : > { %v1469_v42 = vsel %vm1107_vm4, %v1467_v26, %v1468_v1  ;;  %v1123_v32 = vrot.slane %v1085_v52, 1  ;;  %v1164_v51 = vmul.f32 %v2720_v7, %v1040_v24  ;;  %v1236_v54 = vmul.f32 %v2775_v47, %v1039_v13 }
 0x436   : > { %v1495_v14 = vadd.f32 %v1469_v42, %v1418_v25  ;;  %v1546_v36 = vsel %vm1185_vm5, %v1544_v43, %v1545_v23  ;;  %v1124_v53 = vrot.slane %v1086_v44, 1  ;;  %v1201_v55 = vrot.slane %v1163_v50, 2 }
 0x437   : > { %v1202_v58 = vrot.slane %v1164_v51, 2  ;;  %v1261_v59 = vmul.f32 %v2735_v16, %v1039_v13  ;;  %v1262_v11 = vmul.f32 %v2735_v16, %v1040_v24  ;;  %v1244_v63 = vadd.f32 %v1236_v54, %v1222_v37  ;;  %v2977_v37 = vld [vmem:[#allocation2 + $0x60] sm:$0xff] }
 0x438   : > { %v1572_v61 = vadd.f32 %v1546_v36, %v1495_v14  ;;  %v1125_v62 = vsel %vm1107_vm4, %v1123_v32, %v1124_v53  ;;  %v1338_v0 = vmul.f32 %v2749_v29, %v1039_v13  ;;  %v1397_v5 = vadd.f32 %v1373_v35, %v1320_v9 }
 0x439   : > { %v1145_v6 = vadd.f32 %v1125_v62, %v1059_v28  ;;  %v1297_v38 = vrot.slane %v1261_v59, 1  ;;  %v1298_v10 = vrot.slane %v1262_v11, 1  ;;  %v1203_v25 = vsel %vm1185_vm5, %v1201_v55, %v1202_v58  ;;  %v2980_v28 = vld [vmem:[#allocation2 + $0x68] sm:$0x3] }
 0x43a   : > { %v1588_v15 = vmul.f32 0.70710677, %v1572_v61  ;;  %v1339_v26 = vmul.f32 %v2749_v29, %v1040_v24  ;;  %v1374_v19 = vrot.slane %v1338_v0, 2  ;;  %v1411_v52 = vmul.f32 %v2799_v22, %v1039_v13 }
 0x43b   : > { %v1223_v46 = vadd.f32 %v1203_v25, %v1145_v6  ;;  %v1299_v1 = vsel %vm1107_vm4, %v1297_v38, %v1298_v10  ;;  %v1435_v43 = vmul.f32 %v2757_v33, %v1039_v13  ;;  %v1436_v23 = vmul.f32 %v2757_v33, %v1040_v24 }
 0x43c   : > { %2489 = verf.f32 %v1588_v15  ;;  %v1321_v9 = vadd.f32 %v1299_v1, %v1244_v63  ;;  %v1375_v35 = vrot.slane %v1339_v26, 2  ;;  %v1419_v44 = vadd.f32 %v1411_v52, %v1397_v5 }
 0x43d   : > { %v1470_v42 = vrot.slane %v1435_v43, 1  ;;  %v1512_v32 = vmul.f32 %v2788_v56, %v1039_v13  ;;  %v1513_v50 = vmul.f32 %v2788_v56, %v1040_v24  ;;  %v1471_v14 = vrot.slane %v1436_v23, 1 }
 0x43e   : > { %v1376_v51 = vsel %vm1185_vm5, %v1374_v19, %v1375_v35  ;;  %v1237_v36 = vmul.f32 %v2775_v47, %v2977_v37  ;;  %v1263_v53 = vmul.f32 %v2735_v16, %v2977_v37  ;;  %v1264_v59 = vmul.f32 %v2735_v16, %v2980_v28 }
 0x43f   : > { %v1398_v54 = vadd.f32 %v1376_v51, %v1321_v9  ;;  %v1547_v55 = vrot.slane %v1512_v32, 2  ;;  %v1548_v58 = vrot.slane %v1513_v50, 2  ;;  %v1472_v11 = vsel %vm1107_vm4, %v1470_v42, %v1471_v14  ;;  %v3015_v51 = vld [vmem:[#allocation2 + $0x70] sm:$0xff]  ;;  %v3017_v14 = vld [vmem:[#allocation2 + $0x78] sm:$0x3] }
 0x440   : > { %v1245_v13 = vadd.f32 %v1237_v36, %v1223_v46  ;;  %v1300_v62 = vrot.slane %v1263_v53, 1  ;;  %v1340_v24 = vmul.f32 %v2749_v29, %v2977_v37  ;;  %v1496_v63 = vadd.f32 %v1472_v11, %v1419_v44 }
 0x441   : > { %v1549_v0 = vsel %vm1185_vm5, %v1547_v55, %v1548_v58  ;;  %v1301_v5 = vrot.slane %v1264_v59, 1  ;;  %v1341_v6 = vmul.f32 %v2749_v29, %v2980_v28  ;;  %v1412_v10 = vmul.f32 %v2799_v22, %v2977_v37 }
 0x442   : > { %v1377_v38 = vrot.slane %v1340_v24, 2  ;;  %v1437_v15 = vmul.f32 %v2757_v33, %v2977_v37  ;;  %v1438_v25 = vmul.f32 %v2757_v33, %v2980_v28  ;;  %v1573_v26 = vadd.f32 %v1549_v0, %v1496_v63 }
 0x443   : > { %v1302_v19 = vsel %vm1107_vm4, %v1300_v62, %v1301_v5  ;;  %v1378_v46 = vrot.slane %v1341_v6, 2  ;;  %v1514_v1 = vmul.f32 %v2788_v56, %v2977_v37  ;;  %v1420_v43 = vadd.f32 %v1412_v10, %v1398_v54 }
 0x444   : > { %v1322_v52 = vadd.f32 %v1302_v19, %v1245_v13  ;;  %v1473_v9 = vrot.slane %v1437_v15, 1  ;;  %v1474_v35 = vrot.slane %v1438_v25, 1  ;;  %v1580_v23 = vmul.f32 0.5, %v1572_v61 }
 0x445   : > { %v1589_v44 = vmul.f32 0.70710677, %v1573_v26  ;;  %v1379_v42 = vsel %vm1185_vm5, %v1377_v38, %v1378_v46  ;;  %v1515_v32 = vmul.f32 %v2788_v56, %v2980_v28  ;;  %v1550_v54 = vrot.slane %v1514_v1, 2 }
 0x446   : > { %v2490_v36 = vpop.eup %2489  ;;  %v1399_v53 = vadd.f32 %v1379_v42, %v1322_v52  ;;  %v1475_v61 = vsel %vm1107_vm4, %v1473_v9, %v1474_v35  ;;  %v2452_v55 = vpack.c.bf16 %v2923_v34, %v2949_v8  ;;  %v1413_v13 = vmul.f32 %v2799_v22, %v3015_v51 }
 0x447   : > { %v1604_v58 = vadd.f32 1.0, %v2490_v36  ;;  %2491 = verf.f32 %v1589_v44  ;;  %v1497_v59 = vadd.f32 %v1475_v61, %v1420_v43  ;;  %v1551_v11 = vrot.slane %v1515_v32, 2 }
 0x448   : > { %2454 = vmatprep.subr.msk.bf16.mxu0 %vm3011_vm6, %v2452_v55  ;;  %v1439_v62 = vmul.f32 %v2757_v33, %v3015_v51  ;;  %v1440_v24 = vmul.f32 %v2757_v33, %v3017_v14  ;;  %v1516_v63 = vmul.f32 %v2788_v56, %v3015_v51  ;;  %v1581_v8 = vmul.f32 0.5, %v1573_v26 }
 0x449   : > { %v1612_v34 = vmul.f32 %v1604_v58, %v1580_v23  ;;  %v1552_v0 = vsel %vm1185_vm5, %v1550_v54, %v1551_v11  ;;  %v1517_v5 = vmul.f32 %v2788_v56, %v3017_v14  ;;  %2457 = vmatpush3.bf16.xpose.msk.msra.mxu0 %vm3011_vm6, %v2452_v55  ;;  %v1421_v38 = vadd.f32 %v1413_v13, %v1399_v53 }
 0x44a   : > { %v1574_v6 = vadd.f32 %v1552_v0, %v1497_v59  ;;  %v1476_v10 = vrot.slane %v1439_v62, 1  ;;  %v1477_v15 = vrot.slane %v1440_v24, 1  ;;  %v1553_v25 = vrot.slane %v1516_v63, 2 }
 0x44b   : > { %1620 = vst.msk [vmem:[#allocation2 + $0x31] sm:$0xff] %vm316_vm0, %v1612_v34  ;;  %v1554_v19 = vrot.slane %v1517_v5, 2  ;;  %v1060_v46 = vmul.f32 %v2727_v12, %v2977_v37  ;;  %v1087_v26 = vmul.f32 %v2713_v3, %v2977_v37  ;;  %v1061_v43 = vmul.f32 %v2727_v12, %v3015_v51 }
 0x44c   : > { %v1590_v1 = vmul.f32 0.70710677, %v1574_v6  ;;  %v1478_v52 = vsel %vm1107_vm4, %v1476_v10, %v1477_v15  ;;  %v1088_v9 = vmul.f32 %v2713_v3, %v2980_v28  ;;  %v1089_v44 = vmul.f32 %v2713_v3, %v3015_v51 }
 0x44d   : > { %v1498_v35 = vadd.f32 %v1478_v52, %v1421_v38  ;;  %v1555_v23 = vsel %vm1185_vm5, %v1553_v25, %v1554_v19  ;;  %v1090_v42 = vmul.f32 %v2713_v3, %v3017_v14  ;;  %v1126_v32 = vrot.slane %v1087_v26, 1  ;;  %v1046_v25 = vld [vmem:[#allocation2 + $0x88] sm:$0x3] }
 0x44e   : > { %2493 = verf.f32 %v1590_v1  ;;  %v1127_v50 = vrot.slane %v1088_v9, 1  ;;  %v1165_v36 = vmul.f32 %v2720_v7, %v2977_v37  ;;  %v1129_v12 = vrot.slane %v1089_v44, 1 }
 0x44f   : > { %v3054_v53 = vadd.f32 %v1555_v23, %v1498_v35  ;;  %v1130_v61 = vrot.slane %v1090_v42, 1  ;;  %v1166_v54 = vmul.f32 %v2720_v7, %v2980_v28  ;;  %v1167_v58 = vmul.f32 %v2720_v7, %v3015_v51 }
 0x450   : > { %v1128_v55 = vsel %vm1107_vm4, %v1126_v32, %v1127_v50  ;;  %v1168_v3 = vmul.f32 %v2720_v7, %v3017_v14  ;;  %v1204_v59 = vrot.slane %v1165_v36, 2  ;;  %2405 = vmatmul.mubr.msk.f32.vlgmr.msra.gmra.mrb[8].mxu0 %vm316_vm0, %v2694_v57  ;;  %v1582_v11 = vmul.f32 0.5, %v1574_v6  ;;  %v1045_v6 = vld [vmem:[#allocation2 + $0x80] sm:$0xff] }
 0x451   : > { %v2492_v37 = vpop.eup %2491  ;;  %v1591_v13 = vmul.f32 0.70710677, %v3054_v53  ;;  %v1131_v62 = vsel %vm1107_vm4, %v1129_v12, %v1130_v61  ;;  %v1146_v24 = vadd.f32 %v1128_v55, %v1060_v46  ;;  %2407 = vmatprep.mubr.msk.f32.mxu0 %vm316_vm0, %v2751_v31  ;;  %v1205_v34 = vrot.slane %v1166_v54, 2 }
 0x452   : > { %v1605_v28 = vadd.f32 1.0, %v2492_v37  ;;  %v1147_v63 = vadd.f32 %v1131_v62, %v1061_v43  ;;  %v1207_v0 = vrot.slane %v1167_v58, 2  ;;  %v1208_v7 = vrot.slane %v1168_v3, 2 }
 0x453   : > { %2495 = verf.f32 %v1591_v13  ;;  %v1238_v5 = vmul.f32 %v2775_v47, %v3015_v51  ;;  %v1265_v57 = vmul.f32 %v2735_v16, %v3015_v51  ;;  %v1206_v10 = vsel %vm1185_vm5, %v1204_v59, %v1205_v34 }
 0x454   : > { %v1613_v38 = vmul.f32 %v1605_v28, %v1581_v8  ;;  %v1266_v15 = vmul.f32 %v2735_v16, %v3017_v14  ;;  %v1342_v31 = vmul.f32 %v2749_v29, %v3015_v51  ;;  %2408 = vmatmul.mubr.msk.f32.gmra.mrb[10].mxu0 %vm316_vm0, %v2887_v2  ;;  %v1209_v19 = vsel %vm1185_vm5, %v1207_v0, %v1208_v7 }
 0x455   : > { %v1224_v46 = vadd.f32 %v1206_v10, %v1146_v24  ;;  %v1303_v26 = vrot.slane %v1265_v57, 1  ;;  %v1343_v1 = vmul.f32 %v2749_v29, %v3017_v14  ;;  %2410 = vmatprep.mubr.msk.f32.mxu0 %vm316_vm0, %v2899_v18  ;;  %v1225_v8 = vadd.f32 %v1209_v19, %v1147_v63 }
 0x456   : > { %1621 = vst.msk [vmem:[#allocation2 + $0x41] sm:$0xff] %vm316_vm0, %v1613_v38  ;;  %v1304_v52 = vrot.slane %v1266_v15, 1  ;;  %v1380_v43 = vrot.slane %v1342_v31, 2  ;;  %v1239_v51 = vmul.f32 %v2775_v47, %v1045_v6  ;;  %v1267_v2 = vmul.f32 %v2735_v16, %v1045_v6 }
 0x457   : > { %v1246_v9 = vadd.f32 %v1238_v5, %v1224_v46  ;;  %v1381_v35 = vrot.slane %v1343_v1, 2  ;;  %v1268_v23 = vmul.f32 %v2735_v16, %v1046_v25  ;;  %v1344_v32 = vmul.f32 %v2749_v29, %v1045_v6 }
 0x458   : > { %v2494_v44 = vpop.eup %2493  ;;  %v1305_v42 = vsel %vm1107_vm4, %v1303_v26, %v1304_v52  ;;  %v1247_v14 = vadd.f32 %v1239_v51, %v1225_v8  ;;  %v1345_v18 = vmul.f32 %v2749_v29, %v1046_v25  ;;  %2411 = vmatmul.mubr.msk.f32.gmra.mrb[12].mxu0 %vm316_vm0, %v2920_v39  ;;  %v1306_v12 = vrot.slane %v1267_v2, 1  ;;  %v1627_v2 = vld [vmem:[#allocation2 + $0x8] sm:$0x3] }
 0x459   : > { %v1606_v50 = vadd.f32 1.0, %v2494_v44  ;;  %v1323_v36 = vadd.f32 %v1305_v42, %v1246_v9  ;;  %v1382_v47 = vsel %vm1185_vm5, %v1380_v43, %v1381_v35  ;;  %2413 = vmatprep.mubr.msk.f32.mxu0 %vm316_vm0, %v2939_v60  ;;  %v1307_v16 = vrot.slane %v1268_v23, 1  ;;  %v3135_v9 = vld [vmem:[%s3554_s7 + $0x1] ss:$0 sm:$0xff]  ;;  %v3142_v42 = vld [vmem:[%s3554_s7 + $0x2] ss:$0 sm:$0xff] }
 0x45a   : > { %v1383_v61 = vrot.slane %v1344_v32, 2  ;;  %v1384_v54 = vrot.slane %v1345_v18, 2  ;;  %v1414_v55 = vmul.f32 %v2799_v22, %v1045_v6  ;;  %v1441_v29 = vmul.f32 %v2757_v33, %v1045_v6  ;;  %v1626_v35 = vld [vmem:[#allocation2] sm:$0xff] }
 0x45b   : > { %v1614_v58 = vmul.f32 %v1606_v50, %v1582_v11  ;;  %v1400_v3 = vadd.f32 %v1382_v47, %v1323_v36  ;;  %v1442_v59 = vmul.f32 %v2757_v33, %v1046_v25  ;;  %v1583_v39 = vmul.f32 0.5, %v3054_v53  ;;  %v1628_v47 = vld [vmem:[#allocation2 + $0x10] sm:$0xff] }
 0x45c   : > { %v1308_v37 = vsel %vm1107_vm4, %v1306_v12, %v1307_v16  ;;  %v1518_v13 = vmul.f32 %v2788_v56, %v1045_v6  ;;  %v1519_v62 = vmul.f32 %v2788_v56, %v1046_v25  ;;  %2414 = vmatmul.mubr.msk.f32.gmra.mrb[14].mxu0 %vm316_vm0, %v2955_v49  ;;  %v1479_v24 = vrot.slane %v1441_v29, 1  ;;  %v1629_v12 = vld [vmem:[#allocation2 + $0x18] sm:$0x3] }
 0x45d   : > { %v2496_v60 = vpop.eup %2495  ;;  %1622 = vst.msk [vmem:[#allocation2 + $0x51] sm:$0xff] %vm316_vm0, %v1614_v58  ;;  %v1324_v22 = vadd.f32 %v1308_v37, %v1247_v14  ;;  %v1422_v11 = vadd.f32 %v1414_v55, %v1400_v3  ;;  %v1480_v28 = vrot.slane %v1442_v59, 1  ;;  %v1385_v33 = vsel %vm1185_vm5, %v1383_v61, %v1384_v54  ;;  %v3147_v14 = vld [vmem:[%s3554_s7] ss:$0 sm:$0xff]  ;;  %v3156_v58 = vld [vmem:[%s3554_s7 + $0x5] ss:$0 sm:$0xff] }
 0x45e   : > { %v1607_v63 = vadd.f32 1.0, %v2496_v60  ;;  %v1556_v53 = vrot.slane %v1518_v13, 2  ;;  %v1557_v34 = vrot.slane %v1519_v62, 2  ;;  %v1484_v56 = vsel %vm1107_vm4, %v1482_v30, %v1483_v40 }
 0x45f   : > { %v1401_v0 = vadd.f32 %v1385_v33, %v1324_v22  ;;  %v1481_v7 = vsel %vm1107_vm4, %v1479_v24, %v1480_v28  ;;  %v1561_v38 = vsel %vm1185_vm5, %v1559_v41, %v1560_v45  ;;  %v1672_v23 = vmul.f32 %v3135_v9, %v1626_v35  ;;  %v3173_v28 = vld [vmem:[%s3554_s7 + $0x6] ss:$0 sm:$0xff] }
 0x460   : > { %v1615_v5 = vmul.f32 %v1607_v63, %v1583_v39  ;;  %v1499_v49 = vadd.f32 %v1481_v7, %v1422_v11  ;;  %v1558_v6 = vsel %vm1185_vm5, %v1556_v53, %v1557_v34  ;;  %v1673_v44 = vmul.f32 %v3135_v9, %v1627_v2  ;;  %v3163_v39 = vld [vmem:[%s3554_s7 + $0x4] ss:$0 sm:$0xff]  ;;  %v3178_v7 = vld [vmem:[#allocation2 + $0x38] sm:$0x3] }
 0x461   : > { %v1423_v57 = vadd.f32 %v2917_v27, %v1401_v0  ;;  %v1704_v32 = vrot.slane %v1672_v23, 1  ;;  %v1749_v50 = vmul.f32 %v3142_v42, %v1626_v35  ;;  %v1750_v36 = vmul.f32 %v3142_v42, %v1627_v2  ;;  %v3176_v0 = vld [vmem:[#allocation2 + $0x30] sm:$0xff] }
 0x462   : > { %1623 = vst.msk [vmem:[#allocation2 + $0x61] sm:$0xff] %vm316_vm0, %v1615_v5  ;;  %v1576_v10 = vadd.f32 %v1558_v6, %v1499_v49  ;;  %v1705_v18 = vrot.slane %v1673_v44, 1  ;;  %v1651_v16 = vmul.f32 %v3147_v14, %v1626_v35  ;;  %v1674_v3 = vmul.f32 %v3135_v9, %v1628_v47  ;;  %v1631_v6 = vld [vmem:[#allocation2 + $0x28] sm:$0x3] }
 0x463   : > { %v1500_v15 = vadd.f32 %v1484_v56, %v1423_v57  ;;  %v1781_v54 = vrot.slane %v1749_v50, 2  ;;  %v1782_v55 = vrot.slane %v1750_v36, 2  ;;  %v1675_v29 = vmul.f32 %v3135_v9, %v1629_v12  ;;  %v1630_v57 = vld [vmem:[#allocation2 + $0x20] sm:$0xff]  ;;  %v3212_v50 = vld [vmem:[%s3554_s7 + $0xa] ss:$0 sm:$0xff] }
 0x464   : > { %v1592_v20 = vmul.f32 0.70710677, %v1576_v10  ;;  %v1584_v40 = vmul.f32 0.5, %v1576_v10  ;;  %v1706_v61 = vsel %vm1107_vm4, %v1704_v32, %v1705_v18  ;;  %v1848_v13 = vmul.f32 %v3156_v58, %v1628_v47 }
 0x465   : > { %v1577_v31 = vadd.f32 %v1561_v38, %v1500_v15  ;;  %v1736_v59 = vadd.f32 %v1706_v61, %v1651_v16  ;;  %v1783_v37 = vsel %vm1185_vm5, %v1781_v54, %v1782_v55  ;;  %v1849_v62 = vmul.f32 %v3156_v58, %v1629_v12 }
 0x466   : > { %2497 = verf.f32 %v1592_v20  ;;  %v1707_v60 = vrot.slane %v1674_v3, 1  ;;  %v1708_v22 = vrot.slane %v1675_v29, 1  ;;  %v1751_v11 = vmul.f32 %v3142_v42, %v1628_v47 }
 0x467   : > { %v1593_v17 = vmul.f32 0.70710677, %v1577_v31  ;;  %v1585_v46 = vmul.f32 0.5, %v1577_v31  ;;  %v1752_v24 = vmul.f32 %v3142_v42, %v1629_v12  ;;  %v1813_v63 = vadd.f32 %v1783_v37, %v1736_v59 }
 0x468   : > { %v1827_v33 = vmul.f32 %v3163_v39, %v1628_v47  ;;  %v1880_v53 = vrot.slane %v1848_v13, 1  ;;  %v1881_v34 = vrot.slane %v1849_v62, 1  ;;  %v1709_v5 = vsel %vm1107_vm4, %v1707_v60, %v1708_v22  ;;  %v3223_v22 = vld [vmem:[#allocation2 + $0x40] sm:$0xff] }
 0x469   : > { %2499 = verf.f32 %v1593_v17  ;;  %v1925_v56 = vmul.f32 %v3173_v28, %v1628_v47  ;;  %v1926_v49 = vmul.f32 %v3173_v28, %v1629_v12  ;;  %v1652_v38 = vmul.f32 %v3147_v14, %v1628_v47 }
 0x46a   : > { %v1784_v10 = vrot.slane %v1751_v11, 2  ;;  %v1785_v15 = vrot.slane %v1752_v24, 2  ;;  %v1835_v20 = vadd.f32 %v1827_v33, %v1813_v63  ;;  %v1882_v31 = vsel %vm1107_vm4, %v1880_v53, %v1881_v34  ;;  %v3225_v11 = vld [vmem:[#allocation2 + $0x48] sm:$0x3] }
 0x46b   : > { %v1737_v17 = vadd.f32 %v1709_v5, %v1652_v38  ;;  %v1927_v35 = vmul.f32 %v3173_v28, %v1630_v57  ;;  %v1928_v18 = vmul.f32 %v3173_v28, %v1631_v6  ;;  %v1755_v16 = vmul.f32 %v3142_v42, %v3176_v0 }
 0x46c   : > { %v1756_v61 = vmul.f32 %v3142_v42, %v3178_v7  ;;  %v2101_v13 = vmul.f32 %v3212_v50, %v1630_v57  ;;  %v2102_v60 = vmul.f32 %v3212_v50, %v1631_v6  ;;  %v1654_v24 = vmul.f32 %v3147_v14, %v3176_v0 }
 0x46d   : > { %v1960_v37 = vrot.slane %v1927_v35, 2  ;;  %v1753_v63 = vmul.f32 %v3142_v42, %v1630_v57  ;;  %v1754_v33 = vmul.f32 %v3142_v42, %v1631_v6  ;;  %v1961_v53 = vrot.slane %v1928_v18, 2 }
 0x46e   : > { %v1790_v5 = vrot.slane %v1755_v16, 2  ;;  %v3261_v16 = vld [vmem:[#allocation2 + $0x58] sm:$0x3] }
 0x470   : > { %v2498_v30 = vpop.eup %2497 }
 0x471   : > { %v1608_v27 = vadd.f32 1.0, %v2498_v30  ;;  %v3188_v30 = vld [vmem:[%s3554_s7 + $0x9] ss:$0 sm:$0xff] }
 0x473   : > { %v2500_v25 = vpop.eup %2499  ;;  %v1616_v19 = vmul.f32 %v1608_v27, %v1584_v40  ;;  %v1678_v40 = vmul.f32 %v3135_v9, %v3176_v0  ;;  %v1679_v27 = vmul.f32 %v3135_v9, %v3178_v7 }
 0x474   : > { %v1609_v26 = vadd.f32 1.0, %v2500_v25  ;;  %v1850_v25 = vmul.f32 %v3156_v58, %v1630_v57 }
 0x475   : > { %1624 = vst.msk [vmem:[#allocation2 + $0x71] sm:$0xff] %vm316_vm0, %v1616_v19  ;;  %v1851_v19 = vmul.f32 %v3156_v58, %v1631_v6  ;;  %v1713_v2 = vrot.slane %v1678_v40, 1  ;;  %v1714_v23 = vrot.slane %v1679_v27, 1  ;;  %v2134_v40 = vrot.slane %v2102_v60, 2 }
 0x476   : > { %v1617_v21 = vmul.f32 %v1609_v26, %v1585_v46  ;;  %v1957_v46 = vrot.slane %v1925_v56, 2  ;;  %v1958_v26 = vrot.slane %v1926_v49, 2  ;;  %v1883_v44 = vrot.slane %v1850_v25, 1 }
 0x477   : > { %v1884_v32 = vrot.slane %v1851_v19, 1  ;;  %v1715_v62 = vsel %vm1107_vm4, %v1713_v2, %v1714_v23  ;;  %v1791_v56 = vrot.slane %v1756_v61, 2  ;;  %v1787_v27 = vrot.slane %v1753_v63, 2 }
 0x478   : > { %1625 = vst.msk [vmem:[#allocation2 + $0x81] sm:$0xff] %vm316_vm0, %v1617_v21  ;;  %v1786_v21 = vsel %vm1185_vm5, %v1784_v10, %v1785_v15  ;;  %v1959_v36 = vsel %vm1185_vm5, %v1957_v46, %v1958_v26  ;;  %v1739_v10 = vadd.f32 %v1715_v62, %v1654_v24  ;;  %v1788_v25 = vrot.slane %v1754_v33, 2 }
 0x479   : > { %v1885_v49 = vsel %vm1107_vm4, %v1883_v44, %v1884_v32  ;;  %v1792_v26 = vsel %vm1185_vm5, %v1790_v5, %v1791_v56  ;;  %v1931_v2 = vmul.f32 %v3173_v28, %v3223_v22  ;;  %v3253_v44 = vmul.f32 %v3188_v30, %v2889_v4 }
 0x47a   : > { %v1789_v23 = vsel %vm1185_vm5, %v1787_v27, %v1788_v25  ;;  %v2027_v62 = vmul.f32 %v3188_v30, %v3178_v7  ;;  %v1930_v5 = vmul.f32 %v3173_v28, %v3178_v7  ;;  %v2104_v27 = vmul.f32 %v3212_v50, %v3178_v7 }
 0x47b   : > { %v1966_v60 = vrot.slane %v1931_v2, 2  ;;  %v2077_v63 = vrot.slane %v3253_v44, 1 }
 0x523   : > { %v2406_v48 = vpop.f32.mrb[8].mxu0 }
 0x524   : > { %v814_v41 = vpop.f32.mrb[9].mxu0 }
 0x525   : > { %2420 = vmatprep.mubr.msk.f32.mxu1 %vm316_vm0, %v814_v41  ;;  %v1912_v41 = vadd.f32 %v1882_v31, %v1835_v20  ;;  %v1854_v20 = vmul.f32 %v3156_v58, %v3223_v22  ;;  %v1855_v31 = vmul.f32 %v3156_v58, %v3225_v11 }
 0x526   : > { %2421 = vmatmul.mubr.msk.f32.vlgmr.msra.gmra.mrb[2].mxu1 %vm316_vm0, %v2406_v48  ;;  %v1828_v48 = vmul.f32 %v3163_v39, %v1630_v57 }
 0x527   : > { %v2409_v45 = vpop.f32.mrb[10].mxu0  ;;  %v1989_v47 = vadd.f32 %v1959_v36, %v1912_v41  ;;  %v1816_v41 = vadd.f32 %v1792_v26, %v1739_v10  ;;  %v3257_v36 = vld [vmem:[#allocation2 + $0x50] sm:$0xff]  ;;  %v3286_v10 = vmul.f32 %v3212_v50, %v2889_v4  ;;  %v1964_v26 = vrot.slane %v1930_v5, 2  ;;  %v3329_v5 = vld [vmem:[#allocation2 + $0x68] sm:$0x3] }
 0x528   : > { %v824_v1 = vpop.f32.mrb[11].mxu0  ;;  %v2030_v24 = vmul.f32 %v3188_v30, %v3257_v36 }
 0x529   : > { %2423 = vmatprep.mubr.msk.f32.mxu1 %vm316_vm0, %v824_v1  ;;  %v2024_v1 = vmul.f32 %v3188_v30, %v1630_v57 }
 0x52a   : > { %2424 = vmatmul.mubr.msk.f32.gmra.mrb[4].mxu1 %vm316_vm0, %v2409_v45  ;;  %v3201_v45 = vld [vmem:[%s3554_s7 + $0x8] ss:$0 sm:$0xff]  ;;  %v2065_v25 = vrot.slane %v2030_v24, 1 }
 0x52b   : > { %v2412_v8 = vpop.f32.mrb[12].mxu0  ;;  %v2003_v12 = vmul.f32 %v3201_v45, %v1630_v57  ;;  %v2056_v54 = vrot.slane %v2024_v1, 1  ;;  %v1830_v1 = vmul.f32 %v3163_v39, %v3223_v22 }
 0x52c   : > { %v834_v52 = vpop.f32.mrb[13].mxu0 }
 0x52d   : > { %2426 = vmatprep.mubr.msk.f32.mxu1 %vm316_vm0, %v834_v52  ;;  %v1676_v52 = vmul.f32 %v3135_v9, %v1630_v57  ;;  %v2011_v34 = vadd.f32 %v2003_v12, %v1989_v47  ;;  %v1932_v47 = vmul.f32 %v3173_v28, %v3225_v11  ;;  %v1838_v61 = vadd.f32 %v1830_v1, %v1816_v41 }
 0x52e   : > { %2427 = vmatmul.mubr.msk.f32.gmra.mrb[6].mxu1 %vm316_vm0, %v2412_v8  ;;  %v2025_v8 = vmul.f32 %v3188_v30, %v1631_v6  ;;  %v2028_v1 = vmul.f32 %v3188_v30, %v3223_v22 }
 0x52f   : > { %v2415_v43 = vpop.f32.mrb[14].mxu0  ;;  %v1710_v3 = vrot.slane %v1676_v52, 1  ;;  %v1890_v52 = vrot.slane %v1855_v31, 1  ;;  %v1967_v33 = vrot.slane %v1932_v47, 2 }
 0x530   : > { %v844_v51 = vpop.f32.mrb[15].mxu0  ;;  %v2057_v55 = vrot.slane %v2025_v8, 1  ;;  %v1889_v8 = vrot.slane %v1854_v20, 1 }
 0x531   : > { %2429 = vmatprep.mubr.msk.f32.mxu1 %vm316_vm0, %v844_v51  ;;  %v1814_v51 = vadd.f32 %v1786_v21, %v1737_v17  ;;  %v1653_v17 = vmul.f32 %v3147_v14, %v1630_v57  ;;  %v1852_v57 = vmul.f32 %v3156_v58, %v3176_v0 }
 0x532   : > { %2430 = vmatmul.mubr.msk.f32.gmra.mrb[8].mxu1 %vm316_vm0, %v2415_v43  ;;  %v1677_v43 = vmul.f32 %v3135_v9, %v1631_v6  ;;  %v2058_v38 = vsel %vm1107_vm4, %v2056_v54, %v2057_v55  ;;  %v2133_v6 = vrot.slane %v2101_v13, 2  ;;  %v1829_v54 = vmul.f32 %v3163_v39, %v3176_v0 }
 0x533   : > { %v1836_v59 = vadd.f32 %v1828_v48, %v1814_v51  ;;  %v2088_v46 = vadd.f32 %v2058_v38, %v2011_v34  ;;  %v1962_v48 = vsel %vm1185_vm5, %v1960_v37, %v1961_v53  ;;  %v1645_v51 = vld [vmem:[#allocation2 + $0x98] sm:$0x3]  ;;  %v3267_v55 = vmul.f32 %v3201_v45, %v2889_v4 }
 0x534   : > { %v1711_v29 = vrot.slane %v1677_v43, 1  ;;  %v1853_v43 = vmul.f32 %v3156_v58, %v3178_v7  ;;  %v2135_v35 = vsel %vm1185_vm5, %v2133_v6, %v2134_v40  ;;  %v1886_v37 = vrot.slane %v1852_v57, 1 }
 0x535   : > { %v1913_v19 = vadd.f32 %v1885_v49, %v1836_v59  ;;  %v3255_v18 = vadd.f32 %v2135_v35, %v2088_v46  ;;  %v1891_v59 = vsel %vm1107_vm4, %v1889_v8, %v1890_v52  ;;  %v2031_v53 = vmul.f32 %v3188_v30, %v3261_v16 }
 0x536   : > { %v1712_v15 = vsel %vm1107_vm4, %v1710_v3, %v1711_v29  ;;  %v2039_v3 = vmul.f32 %v3188_v30, %v1645_v51  ;;  %v2026_v29 = vmul.f32 %v3188_v30, %v3176_v0  ;;  %v1887_v13 = vrot.slane %v1853_v43, 1 }
 0x537   : > { %v1738_v21 = vadd.f32 %v1712_v15, %v1653_v17  ;;  %v1990_v32 = vadd.f32 %v1962_v48, %v1913_v19  ;;  %v1929_v34 = vmul.f32 %v3173_v28, %v3176_v0  ;;  %v1915_v56 = vadd.f32 %v1891_v59, %v1838_v61 }
 0x538   : > { %v2078_v38 = vrot.slane %v2039_v3, 1  ;;  %v2004_v15 = vmul.f32 %v3201_v45, %v3176_v0  ;;  %v2059_v20 = vrot.slane %v2026_v29, 1  ;;  %v1888_v31 = vsel %vm1107_vm4, %v1886_v37, %v1887_v13 }
 0x539   : > { %v1815_v12 = vadd.f32 %v1789_v23, %v1738_v21  ;;  %v3292_v17 = vmul.f32 %v3212_v50, %v1645_v51  ;;  %v2060_v6 = vrot.slane %v2027_v62, 1  ;;  %v2103_v40 = vmul.f32 %v3212_v50, %v3176_v0 }
 0x53a   : > { %v1968_v4 = vsel %vm1185_vm5, %v1966_v60, %v1967_v33  ;;  %v2066_v19 = vrot.slane %v2031_v53, 1  ;;  %v1963_v46 = vrot.slane %v1929_v34, 2  ;;  %v2006_v48 = vmul.f32 %v3201_v45, %v3257_v36  ;;  %v3327_v34 = vld [vmem:[#allocation2 + $0x60] sm:$0xff] }
 0x53b   : > { %v1837_v49 = vadd.f32 %v1829_v54, %v1815_v12  ;;  %v1992_v21 = vadd.f32 %v1968_v4, %v1915_v56  ;;  %v2012_v8 = vadd.f32 %v2004_v15, %v1990_v32  ;;  %v2029_v0 = vmul.f32 %v3188_v30, %v3225_v11  ;;  %v3342_v4 = vld [vmem:[#allocation2 + $0x78] sm:$0x3] }
 0x53c   : > { %v1682_v7 = vmul.f32 %v3135_v9, %v3257_v36  ;;  %v1683_v52 = vmul.f32 %v3135_v9, %v3261_v16  ;;  %v2061_v57 = vsel %vm1107_vm4, %v2059_v20, %v2060_v6  ;;  %v2136_v43 = vrot.slane %v2103_v40, 2 }
 0x53d   : > { %v1914_v41 = vadd.f32 %v1888_v31, %v1837_v49  ;;  %v2137_v51 = vrot.slane %v2104_v27, 2  ;;  %v2107_v35 = vmul.f32 %v3212_v50, %v3257_v36  ;;  %v2067_v2 = vsel %vm1107_vm4, %v2065_v25, %v2066_v19  ;;  %v3340_v25 = vld [vmem:[#allocation2 + $0x70] sm:$0xff] }
 0x53e   : > { %v2108_v23 = vmul.f32 %v3212_v50, %v3261_v16  ;;  %v1965_v44 = vsel %vm1185_vm5, %v1963_v46, %v1964_v26  ;;  %v2005_v32 = vmul.f32 %v3201_v45, %v3223_v22  ;;  %v2014_v47 = vadd.f32 %v2006_v48, %v1992_v21 }
 0x53f   : > { %v1991_v12 = vadd.f32 %v1965_v44, %v1914_v41  ;;  %v2062_v61 = vrot.slane %v2028_v1, 1  ;;  %v2105_v54 = vmul.f32 %v3212_v50, %v3223_v22  ;;  %v2063_v3 = vrot.slane %v2029_v0, 1 }
 0x540   : > { %v2106_v29 = vmul.f32 %v3212_v50, %v3225_v11  ;;  %v1719_v59 = vrot.slane %v1682_v7, 1  ;;  %v1720_v37 = vrot.slane %v1683_v52, 1  ;;  %v2089_v13 = vadd.f32 %v2061_v57, %v2012_v8 }
 0x541   : > { %v3323_v62 = vsel %vm1107_vm4, %v2077_v63, %v2078_v38  ;;  %v2154_v60 = vrot.slane %v3286_v10, 2  ;;  %v2155_v24 = vrot.slane %v3292_v17, 2  ;;  %v2142_v33 = vrot.slane %v2107_v35, 2 }
 0x542   : > { %v2143_v53 = vrot.slane %v2108_v23, 2  ;;  %v1759_v56 = vmul.f32 %v3142_v42, %v3257_v36  ;;  %v1760_v49 = vmul.f32 %v3142_v42, %v3261_v16  ;;  %v2138_v15 = vsel %vm1185_vm5, %v2136_v43, %v2137_v51 }
 0x543   : > { %v2091_v63 = vadd.f32 %v2067_v2, %v2014_v47  ;;  %v2013_v38 = vadd.f32 %v2005_v32, %v1991_v12  ;;  %v2139_v20 = vrot.slane %v2105_v54, 2  ;;  %v2064_v31 = vsel %vm1107_vm4, %v2062_v61, %v2063_v3 }
 0x544   : > { %v2140_v6 = vrot.slane %v2106_v29, 2  ;;  %v1656_v40 = vmul.f32 %v3147_v14, %v3257_v36  ;;  %v1721_v27 = vsel %vm1107_vm4, %v1719_v59, %v1720_v37  ;;  %v1858_v19 = vmul.f32 %v3156_v58, %v3327_v34 }
 0x545   : > { %v1859_v46 = vmul.f32 %v3156_v58, %v3329_v5  ;;  %v1680_v26 = vmul.f32 %v3135_v9, %v3223_v22  ;;  %v1681_v21 = vmul.f32 %v3135_v9, %v3225_v11  ;;  %v3352_v48 = vadd.f32 %v2138_v15, %v2089_v13 }
 0x546   : > { %v2144_v41 = vsel %vm1185_vm5, %v2142_v33, %v2143_v53  ;;  %v1796_v1 = vrot.slane %v1759_v56, 2  ;;  %v1797_v8 = vrot.slane %v1760_v49, 2  ;;  %v2090_v7 = vadd.f32 %v2064_v31, %v2013_v38 }
 0x547   : > { %v3355_v0 = vadd.f32 %v2144_v41, %v2091_v63  ;;  %v1741_v52 = vadd.f32 %v1721_v27, %v1656_v40  ;;  %v1935_v57 = vmul.f32 %v3173_v28, %v3327_v34  ;;  %v2141_v43 = vsel %vm1185_vm5, %v2139_v20, %v2140_v6 }
 0x548   : > { %v1936_v51 = vmul.f32 %v3173_v28, %v3329_v5  ;;  %v1686_v35 = vmul.f32 %v3135_v9, %v3340_v25  ;;  %v1687_v2 = vmul.f32 %v3135_v9, %v3342_v4  ;;  %v1895_v23 = vrot.slane %v1858_v19, 1 }
 0x549   : > { %v1896_v44 = vrot.slane %v1859_v46, 1  ;;  %v1716_v32 = vrot.slane %v1680_v26, 1  ;;  %v1717_v47 = vrot.slane %v1681_v21, 1  ;;  %v1798_v12 = vsel %vm1185_vm5, %v1796_v1, %v1797_v8 }
 0x54a   : > { %v1832_v61 = vmul.f32 %v3163_v39, %v3327_v34  ;;  %v1684_v54 = vmul.f32 %v3135_v9, %v3327_v34  ;;  %v1685_v3 = vmul.f32 %v3135_v9, %v3329_v5  ;;  %v3373_v29 = vadd.f32 %v2141_v43, %v2090_v7 }
 0x54b   : > { %v1818_v59 = vadd.f32 %v1798_v12, %v1741_v52  ;;  %v1972_v37 = vrot.slane %v1935_v57, 2  ;;  %v1757_v13 = vmul.f32 %v3142_v42, %v3223_v22  ;;  %v1973_v33 = vrot.slane %v1936_v51, 2 }
 0x54c   : > { %v1758_v53 = vmul.f32 %v3142_v42, %v3225_v11  ;;  %v1725_v56 = vrot.slane %v1686_v35, 1  ;;  %v1726_v49 = vrot.slane %v1687_v2, 1  ;;  %v1897_v15 = vsel %vm1107_vm4, %v1895_v23, %v1896_v44  ;;  %v3416_v23 = vld [vmem:[#allocation2 + $0x80] sm:$0xff]  ;;  %v3418_v44 = vld [vmem:[#allocation2 + $0x88] sm:$0x3] }
 0x54d   : > { %v3382_v63 = vmul.f32 %v3201_v45, %v3340_v25  ;;  %v3386_v9 = vmul.f32 %v3188_v30, %v3340_v25  ;;  %v1718_v38 = vsel %vm1107_vm4, %v1716_v32, %v1717_v47  ;;  %v1763_v20 = vmul.f32 %v3142_v42, %v3340_v25 }
 0x54e   : > { %v1764_v11 = vmul.f32 %v3142_v42, %v3342_v4  ;;  %v1722_v31 = vrot.slane %v1684_v54, 1  ;;  %v1723_v6 = vrot.slane %v1685_v3, 1  ;;  %v1840_v40 = vadd.f32 %v1832_v61, %v1818_v59 }
 0x54f   : > { %v3395_v27 = vmul.f32 %v3188_v30, %v3342_v4  ;;  %v1655_v19 = vmul.f32 %v3147_v14, %v3223_v22  ;;  %v1793_v46 = vrot.slane %v1757_v13, 2  ;;  %v1794_v26 = vrot.slane %v1758_v53, 2 }
 0x550   : > { %v1727_v21 = vsel %vm1107_vm4, %v1725_v56, %v1726_v49  ;;  %v1761_v41 = vmul.f32 %v3142_v42, %v3327_v34  ;;  %v1762_v1 = vmul.f32 %v3142_v42, %v3329_v5  ;;  %v1856_v7 = vmul.f32 %v3156_v58, %v3257_v36 }
 0x551   : > { %v1740_v8 = vadd.f32 %v1718_v38, %v1655_v19  ;;  %v1857_v52 = vmul.f32 %v3156_v58, %v3261_v16  ;;  %v1658_v22 = vmul.f32 %v3147_v14, %v3340_v25  ;;  %v3412_v57 = vmul.f32 %v3212_v50, %v3340_v25 }
 0x552   : > { %v1802_v43 = vrot.slane %v1763_v20, 2  ;;  %v1803_v51 = vrot.slane %v1764_v11, 2  ;;  %v1724_v35 = vsel %vm1107_vm4, %v1722_v31, %v1723_v6  ;;  %v1917_v2 = vadd.f32 %v1897_v15, %v1840_v40 }
 0x553   : > { %v1974_v42 = vsel %vm1185_vm5, %v1972_v37, %v1973_v33  ;;  %v1743_v32 = vadd.f32 %v1727_v21, %v1658_v22  ;;  %v1657_v47 = vmul.f32 %v3147_v14, %v3327_v34  ;;  %v1795_v12 = vsel %vm1185_vm5, %v1793_v46, %v1794_v26 }
 0x554   : > { %v1831_v61 = vmul.f32 %v3163_v39, %v3257_v36  ;;  %v1799_v54 = vrot.slane %v1761_v41, 2  ;;  %v1800_v3 = vrot.slane %v1762_v1, 2  ;;  %v1817_v59 = vadd.f32 %v1795_v12, %v1740_v8 }
 0x555   : > { %v1892_v13 = vrot.slane %v1856_v7, 1  ;;  %v1893_v53 = vrot.slane %v1857_v52, 1  ;;  %v1742_v56 = vadd.f32 %v1724_v35, %v1657_v47  ;;  %v2071_v37 = vrot.slane %v3386_v9, 1 }
 0x556   : > { %v1804_v33 = vsel %vm1185_vm5, %v1802_v43, %v1803_v51  ;;  %v1862_v49 = vmul.f32 %v3156_v58, %v3416_v23  ;;  %v1863_v14 = vmul.f32 %v3156_v58, %v3418_v44  ;;  %v2112_v15 = vmul.f32 %v3212_v50, %v3342_v4 }
 0x557   : > { %v1933_v38 = vmul.f32 %v3173_v28, %v3257_v36  ;;  %v1934_v20 = vmul.f32 %v3173_v28, %v3261_v16  ;;  %v1820_v11 = vadd.f32 %v1804_v33, %v1743_v32  ;;  %v1994_v31 = vadd.f32 %v1974_v42, %v1917_v2 }
 0x558   : > { %v1801_v9 = vsel %vm1185_vm5, %v1799_v54, %v1800_v3  ;;  %v1860_v6 = vmul.f32 %v3156_v58, %v3340_v25  ;;  %v1861_v40 = vmul.f32 %v3156_v58, %v3342_v4  ;;  %v1839_v19 = vadd.f32 %v1831_v61, %v1817_v59 }
 0x559   : > { %v1894_v46 = vsel %vm1107_vm4, %v1892_v13, %v1893_v53  ;;  %v1834_v26 = vmul.f32 %v3163_v39, %v3416_v23  ;;  %v1819_v36 = vadd.f32 %v1801_v9, %v1742_v56  ;;  %v1901_v21 = vrot.slane %v1862_v49, 1  ;;  %v3468_v56 = vld [vmem:[%s3552_s5] ss:$0 sm:$0xff] }
 0x55a   : > { %v1902_v41 = vrot.slane %v1863_v14, 1  ;;  %v1939_v16 = vmul.f32 %v3173_v28, %v3416_v23  ;;  %v1940_v1 = vmul.f32 %v3173_v28, %v3418_v44  ;;  %v1969_v8 = vrot.slane %v1933_v38, 2 }
 0x55b   : > { %v1970_v7 = vrot.slane %v1934_v20, 2  ;;  %v1842_v52 = vadd.f32 %v1834_v26, %v1820_v11  ;;  %v1833_v58 = vmul.f32 %v3163_v39, %v3340_v25  ;;  %v1898_v22 = vrot.slane %v1860_v6, 1 }
 0x55c   : > { %v1899_v43 = vrot.slane %v1861_v40, 1  ;;  %v1937_v51 = vmul.f32 %v3173_v28, %v3340_v25  ;;  %v1938_v35 = vmul.f32 %v3173_v28, %v3342_v4  ;;  %v2072_v2 = vrot.slane %v3395_v27, 1 }
 0x55d   : > { %v1916_v42 = vadd.f32 %v1894_v46, %v1839_v19  ;;  %v2032_v32 = vmul.f32 %v3188_v30, %v3327_v34  ;;  %v1841_v47 = vadd.f32 %v1833_v58, %v1819_v36  ;;  %v2033_v12 = vmul.f32 %v3188_v30, %v3329_v5 }
 0x55e   : > { %v1903_v39 = vsel %vm1107_vm4, %v1901_v21, %v1902_v41  ;;  %v1978_v61 = vrot.slane %v1939_v16, 2  ;;  %v1979_v54 = vrot.slane %v1940_v1, 2  ;;  %v2016_v3 = vadd.f32 %v3382_v63, %v1994_v31 }
 0x55f   : > { %v2148_v25 = vrot.slane %v3412_v57, 2  ;;  %v2149_v59 = vrot.slane %v2112_v15, 2  ;;  %v1919_v28 = vadd.f32 %v1903_v39, %v1842_v52  ;;  %v1971_v4 = vsel %vm1185_vm5, %v1969_v8, %v1970_v7 }
 0x560   : > { %v1900_v27 = vsel %vm1107_vm4, %v1898_v22, %v1899_v43  ;;  %v1975_v13 = vrot.slane %v1937_v51, 2  ;;  %v1976_v53 = vrot.slane %v1938_v35, 2  ;;  %v2073_v33 = vsel %vm1107_vm4, %v2071_v37, %v2072_v2 }
 0x561   : > { %v1993_v49 = vadd.f32 %v1971_v4, %v1916_v42  ;;  %v2109_v63 = vmul.f32 %v3212_v50, %v3327_v34  ;;  %v1918_v57 = vadd.f32 %v1900_v27, %v1841_v47  ;;  %v2068_v14 = vrot.slane %v2032_v32, 1 }
 0x562   : > { %v2069_v15 = vrot.slane %v2033_v12, 1  ;;  %v2110_v38 = vmul.f32 %v3212_v50, %v3329_v5  ;;  %v1980_v20 = vsel %vm1185_vm5, %v1978_v61, %v1979_v54  ;;  %v2093_v31 = vadd.f32 %v2073_v33, %v2016_v3 }
 0x563   : > { %v2150_v9 = vsel %vm1185_vm5, %v2148_v25, %v2149_v59  ;;  %v2007_v37 = vmul.f32 %v3201_v45, %v3327_v34  ;;  %v1996_v6 = vadd.f32 %v1980_v20, %v1919_v28  ;;  %v1977_v46 = vsel %vm1185_vm5, %v1975_v13, %v1976_v53  ;;  %v2504_v28 = vld [vmem:[%s2587_s14 + $0x10] sm:$0xff]  ;;  %v2506_v20 = vld [vmem:[%s2587_s14 + $0x20] sm:$0xff] }
 0x564   : > { %v2036_v26 = vmul.f32 %v3188_v30, %v3416_v23  ;;  %v2037_v5 = vmul.f32 %v3188_v30, %v3418_v44  ;;  %v2145_v41 = vrot.slane %v2109_v63, 2  ;;  %v1995_v16 = vadd.f32 %v1977_v46, %v1918_v57  ;;  %v2508_v46 = vld [vmem:[%s2587_s14 + $0x30] sm:$0xff] }
 0x565   : > { %v2015_v21 = vadd.f32 %v2007_v37, %v1993_v49  ;;  %v2070_v1 = vsel %vm1107_vm4, %v2068_v14, %v2069_v15  ;;  %v2146_v8 = vrot.slane %v2110_v38, 2  ;;  %v2009_v7 = vmul.f32 %v3201_v45, %v3416_v23  ;;  %v2501_v45 = vld [vmem:[%s2587_s14 + $0x8] sm:$0xff] }
 0x566   : > { %v2018_v58 = vadd.f32 %v3267_v55, %v1996_v6  ;;  %v2114_v22 = vmul.f32 %v3212_v50, %v3418_v44  ;;  %v2074_v2 = vrot.slane %v2036_v26, 1  ;;  %v2075_v42 = vrot.slane %v2037_v5, 1  ;;  %v2505_v49 = vld [vmem:[%s2587_s14 + $0x28] sm:$0xff] }
 0x567   : > { %v2092_v55 = vadd.f32 %v2070_v1, %v2015_v21  ;;  %v2017_v12 = vadd.f32 %v2009_v7, %v1995_v16  ;;  %v2156_v44 = vsel %vm1185_vm5, %v2154_v60, %v2155_v24  ;;  %v2147_v54 = vsel %vm1185_vm5, %v2145_v41, %v2146_v8 }
 0x568   : > { %v2095_v3 = vadd.f32 %v3323_v62, %v2018_v58  ;;  %v2076_v60 = vsel %vm1107_vm4, %v2074_v2, %v2075_v42  ;;  %v2152_v24 = vrot.slane %v2114_v22, 2 }
 0x569   : > { %v2169_v27 = vadd.f32 %v2147_v54, %v2092_v55  ;;  %v2094_v13 = vadd.f32 %v2076_v60, %v2017_v12 }
 0x56a   : > { %v2172_v14 = vadd.f32 %v2156_v44, %v2095_v3 }
 0x5f9   : > { %v2422_v11 = vpop.f32.mrb[2].mxu1 }
 0x5fa   : > { %v958_v40 = vadd.f32 %v2422_v11, %v3468_v56  ;;  %v952_v19 = vpop.f32.mrb[3].mxu1 }
 0x5fb   : > { %v953_v36 = vadd.f32 %v3468_v56, %v952_v19 }
 0x5fc   : > { %v2174_v34 = vadd.f32 %v3352_v48, %v958_v40  ;;  %v2113_v48 = vmul.f32 %v3212_v50, %v3416_v23  ;;  %v2170_v23 = vadd.f32 %v2150_v9, %v2093_v31  ;;  %v2507_v40 = vld [vmem:[%s2587_s14 + $0x38] sm:$0xff] }
 0x5fd   : > { %v2173_v30 = vadd.f32 %v3255_v18, %v953_v36  ;;  %v2425_v52 = vpop.f32.mrb[4].mxu1  ;;  %v2502_v18 = vld [vmem:[%s2587_s14] sm:$0xff] }
 0x5fe   : > { %v2182_v43 = vadd.f32 %v2501_v45, %v2174_v34  ;;  %v968_v51 = vadd.f32 %v2425_v52, %v3468_v56  ;;  %v962_v35 = vpop.f32.mrb[5].mxu1  ;;  %v2151_v25 = vrot.slane %v2113_v48, 2 }
 0x5ff   : > { %v2181_v32 = vadd.f32 %v2502_v18, %v2173_v30  ;;  %v963_v47 = vadd.f32 %v3468_v56, %v962_v35 }
 0x600   : > { %2190 = vst.msk [vmem:[%s3495_s12 + $0x8] sm:$0xff] %vm316_vm0, %v2182_v43  ;;  %v2176_v50 = vadd.f32 %v3355_v0, %v968_v51  ;;  %v2503_v0 = vld [vmem:[%s2587_s14 + $0x18] sm:$0xff]  ;;  %v2153_v38 = vsel %vm1185_vm5, %v2151_v25, %v2152_v24 }
 0x601   : > { %2189 = vst.msk [vmem:[%s3495_s12] sm:$0xff] %vm316_vm0, %v2181_v32  ;;  %v2175_v39 = vadd.f32 %v3373_v29, %v963_v47  ;;  %v2428_v61 = vpop.f32.mrb[6].mxu1  ;;  %v2171_v9 = vadd.f32 %v2153_v38, %v2094_v13 }
 0x602   : > { %v2184_v59 = vadd.f32 %v2503_v0, %v2176_v50  ;;  %v978_v17 = vadd.f32 %v2428_v61, %v3468_v56  ;;  %v972_v10 = vpop.f32.mrb[7].mxu1 }
 0x603   : > { %v2183_v29 = vadd.f32 %v2504_v28, %v2175_v39  ;;  %v973_v4 = vadd.f32 %v3468_v56, %v972_v10 }
 0x604   : > { %2192 = vst.msk [vmem:[%s3495_s12 + $0x18] sm:$0xff] %vm316_vm0, %v2184_v59  ;;  %v2178_v62 = vadd.f32 %v2170_v23, %v978_v17 }
 0x605   : > { %2191 = vst.msk [vmem:[%s3495_s12 + $0x10] sm:$0xff] %vm316_vm0, %v2183_v29  ;;  %v2177_v53 = vadd.f32 %v2169_v27, %v973_v4  ;;  %v2431_v33 = vpop.f32.mrb[8].mxu1 }
 0x606   : > { %v2186_v63 = vadd.f32 %v2505_v49, %v2178_v62  ;;  %v988_v57 = vadd.f32 %v2431_v33, %v3468_v56  ;;  %v982_v15 = vpop.f32.mrb[9].mxu1 }
 0x607   : > { %v2185_v11 = vadd.f32 %v2506_v20, %v2177_v53  ;;  %v983_v31 = vadd.f32 %v3468_v56, %v982_v15 }
 0x608   : > { %2194 = vst.msk [vmem:[%s3495_s12 + $0x28] sm:$0xff] %vm316_vm0, %v2186_v63  ;;  %v2180_v37 = vadd.f32 %v2172_v14, %v988_v57 }
 0x609   : > { %2193 = vst.msk [vmem:[%s3495_s12 + $0x20] sm:$0xff] %vm316_vm0, %v2185_v11  ;;  %v2179_v6 = vadd.f32 %v2171_v9, %v983_v31 }
 0x60a   : > { %v2188_v19 = vadd.f32 %v2507_v40, %v2180_v37 }
 0x60b   : > { %v2187_v26 = vadd.f32 %v2508_v46, %v2179_v6 }
 0x60c   : > { %2196 = vst.msk [vmem:[%s3495_s12 + $0x38] sm:$0xff] %vm316_vm0, %v2188_v19 }
 0x60d   : > { %2195 = vst.msk [vmem:[%s3495_s12 + $0x30] sm:$0xff] %vm316_vm0, %v2187_v26 }
 0x60e PF: > { %s18_s27 = sadd.s32 1, %s2515_s27  }
 0x60f   : > { %p15_p4 = scmp.ge.s32.totalorder %s18_s27, 4  }
 0x611   :  { %17 = sbr.rel (!%p15_p4) target bundleno = 1 (0x1), region = 87 }

</bundles_post_ra>
